<compile_context>
chip_gen: v7x
topology: tpu7x:2x2x1
jax: 0.10.0
libtpu: 0.0.40
codegen_flags: <defaults>
</compile_context>

<pallas_src>
import functools

import jax
import jax.numpy as jnp
from jax import lax
from jax.experimental import pallas as pl
from jax.experimental.pallas import tpu as pltpu

_MASK_VALUE = -1e30  # large finite negative; exp underflows to 0, never NaN


# ----------------------------------------------------------------------------
# Fused kernel: one block of B_blk batch elements per grid step.
#   x_ref     : (B_blk*T, C)        f32 (cast to bf16 in-kernel for the MXU)
#   wqkv_ref  : (C, 3*H*Dh)         bf16  [Wq*Dh^-0.5 | Wk | Wv], head-major
#   wproj_ref : (H*Dh, C)           bf16
#   bproj_ref : (1, C)              f32
#   o_ref     : (B_blk*T, C)        f32
# ----------------------------------------------------------------------------
def _mha_fused_kernel(x_ref, wqkv_ref, wproj_ref, bproj_ref, o_ref,
                      *, batch_blk, seq_len, num_heads, head_size):
    Bb, T, H, Dh = batch_blk, seq_len, num_heads, head_size
    HDh = H * Dh
    M = Bb * T

    # bf16 MXU operands, f32 accumulation.  One lane-dense matmul computes
    # Q, K, V for every head of every row in the block.
    x = x_ref[...].astype(jnp.bfloat16)                              # (M, C)
    qkv = jnp.dot(x, wqkv_ref[...],
                  preferred_element_type=jnp.float32)                # (M, 3*H*Dh) f32 acc
    qkv = qkv.astype(jnp.bfloat16)                                   # MXU operands only

    # Causal (lower-triangular) mask, shared across heads and batch.
    row = lax.broadcasted_iota(jnp.int32, (T, T), 0)
    col = lax.broadcasted_iota(jnp.int32, (T, T), 1)
    causal = col <= row                                              # (T, T)

    head_outs = []
    for h in range(H):                                               # static, H small
        # Static lane slices of the fused QKV result; reshape (M,Dh)->(Bb,T,Dh)
        # is a pure leading-dim split (minor dim unchanged), i.e. free.
        q = qkv[:, h * Dh:(h + 1) * Dh].reshape(Bb, T, Dh)           # pre-scaled by Dh^-0.5
        k = qkv[:, HDh + h * Dh:HDh + (h + 1) * Dh].reshape(Bb, T, Dh)
        v = qkv[:, 2 * HDh + h * Dh:2 * HDh + (h + 1) * Dh].reshape(Bb, T, Dh)

        # q @ k^T batched over the block's batch elements; contracting the Dh
        # axis of both sides -> no explicit transpose of K.
        scores = jnp.einsum('btd,bsd->bts', q, k,
                            preferred_element_type=jnp.float32)      # (Bb, T, T) f32
        scores = jnp.where(causal, scores, _MASK_VALUE)

        # Softmax in f32 (VPU/EUP); diagonal always unmasked -> finite max.
        m = jnp.max(scores, axis=-1, keepdims=True)
        p = jnp.exp(scores - m)
        denom = jnp.sum(p, axis=-1, keepdims=True)
        wei = p * pl.reciprocal(denom, approx=True)                  # EUP reciprocal
        # TODO(synk): attention dropout (p=0.25) is identity in eval/inference mode.

        head_outs.append(
            jnp.einsum('bts,bsd->btd', wei.astype(jnp.bfloat16), v,
                       preferred_element_type=jnp.float32))          # (Bb, T, Dh)

    # Concatenate heads along lanes and flatten back to (M, H*Dh) for one big
    # lane-dense output-projection matmul.
    cat = jnp.concatenate(head_outs, axis=-1).reshape(M, HDh)

    y = jnp.dot(cat.astype(jnp.bfloat16), wproj_ref[...],
                preferred_element_type=jnp.float32)                  # (M, C) f32
    y = y + bproj_ref[...]                                           # (1, C) broadcasts
    # TODO(synk): output dropout (p=0.25) is identity in eval/inference mode.

    o_ref[...] = y.astype(o_ref.dtype)                               # lane-dense store


def multi_head_attention(x, wq, wk, wv, w_proj, b_proj):
    """x: (B,T,C); wq/wk/wv: (H,C,Dh); w_proj: (H*Dh, C); b_proj: (1, C)."""
    B, T, C = x.shape
    H, _, Dh = wq.shape
    scale = Dh ** -0.5

    # Trace-time weight packing: (H, C, Dh) -> (C, H*Dh), head-major along
    # lanes; fold the attention scale into Wq; cast MXU weights to bf16.
    wq_cat = jnp.transpose(wq, (1, 0, 2)).reshape(C, H * Dh) * scale
    wk_cat = jnp.transpose(wk, (1, 0, 2)).reshape(C, H * Dh)
    wv_cat = jnp.transpose(wv, (1, 0, 2)).reshape(C, H * Dh)
    w_qkv = jnp.concatenate([wq_cat, wk_cat, wv_cat], axis=-1).astype(jnp.bfloat16)
    w_proj_b = w_proj.astype(jnp.bfloat16)
    b_proj_f = b_proj.astype(jnp.float32)

    # Two grid blocks when B is even (keeps both v7x TensorCores busy, and each
    # block folds B/2 batch elements into the matmul M dimension); otherwise a
    # single block processes everything in one invocation.
    num_blocks = 2 if (B >= 2 and B % 2 == 0) else 1
    B_blk = B // num_blocks
    M = B_blk * T

    # Free row-major relabeling: fold batch into rows so the kernel sees flat
    # lane-dense (rows, C) slabs for both input and output.
    x2 = x.reshape(B * T, C)

    kernel = functools.partial(_mha_fused_kernel, batch_blk=B_blk, seq_len=T,
                               num_heads=H, head_size=Dh)

    out2 = pl.pallas_call(
        kernel,
        out_shape=jax.ShapeDtypeStruct((B * T, C), x.dtype),
        grid=(num_blocks,),
        in_specs=[
            pl.BlockSpec((M, C), lambda i: (i, 0)),
            pl.BlockSpec((C, 3 * H * Dh), lambda i: (0, 0)),
            pl.BlockSpec((H * Dh, C), lambda i: (0, 0)),
            pl.BlockSpec((1, C), lambda i: (0, 0)),
        ],
        out_specs=pl.BlockSpec((M, C), lambda i: (i, 0)),
        compiler_params=pltpu.CompilerParams(
            dimension_semantics=("parallel",)),   # blocks shard across TCs on v7x
    )(x2, w_qkv, w_proj_b, b_proj_f)

    return out2.reshape(B, T, C)


# ----------------------------------------------------------------------------
# Pure-JAX reference (mirrors the PyTorch forward in eval mode, f32).
# ----------------------------------------------------------------------------
def reference(x, wq, wk, wv, w_proj, b_proj):
    B, T, C = x.shape
    H, _, Dh = wq.shape
    mask = jnp.tril(jnp.ones((T, T), dtype=bool))
    outs = []
    for h in range(H):
        q = x @ wq[h]
        k = x @ wk[h]
        v = x @ wv[h]
        wei = (q @ jnp.swapaxes(k, -1, -2)) * (Dh ** -0.5)
        wei = jnp.where(mask, wei, -jnp.inf)
        wei = jax.nn.softmax(wei, axis=-1)
        outs.append(wei @ v)
    cat = jnp.concatenate(outs, axis=-1)
    return cat @ w_proj + b_proj[0]


if __name__ == "__main__":
    # Small shapes consistent with the module structure (n_embd = H * Dh).
    # C = 128 keeps every block lane-dense; B = 4 -> 2 grid blocks of 2 batch
    # elements each (batch folded into the matmul M dimension).
    B, T = 4, 32
    num_heads, head_size = 4, 32
    n_embd = num_heads * head_size  # 128

    key = jax.random.PRNGKey(0)
    kx, kq, kk, kv, kp, kb = jax.random.split(key, 6)

    x = jax.random.normal(kx, (B, T, n_embd), dtype=jnp.float32)

    # PyTorch Linear(n_embd, head_size, bias=False) weight is (Dh, C); we store
    # the transposed (C, Dh) per head so the kernel does x @ W directly.
    scale = 1.0 / jnp.sqrt(jnp.float32(n_embd))
    wq = jax.random.uniform(kq, (num_heads, n_embd, head_size), jnp.float32, -scale, scale)
    wk = jax.random.uniform(kk, (num_heads, n_embd, head_size), jnp.float32, -scale, scale)
    wv = jax.random.uniform(kv, (num_heads, n_embd, head_size), jnp.float32, -scale, scale)

    # proj: Linear(H*Dh, n_embd) -> stored transposed as (H*Dh, n_embd); bias (1, n_embd).
    pscale = 1.0 / jnp.sqrt(jnp.float32(num_heads * head_size))
    w_proj = jax.random.uniform(kp, (num_heads * head_size, n_embd), jnp.float32, -pscale, pscale)
    b_proj = jax.random.uniform(kb, (1, n_embd), jnp.float32, -pscale, pscale)

    out = multi_head_attention(x, wq, wk, wv, w_proj, b_proj)
    out = jax.block_until_ready(out)

    ref = reference(x, wq, wk, wv, w_proj, b_proj)
    assert out.shape == (B, T, n_embd)
    # Tolerance reflects bf16 MXU operands (f32 accumulation) plus the EUP
    # approximate reciprocal in the softmax denominator (inference-grade).
    assert jnp.allclose(out, ref, atol=3e-2, rtol=3e-2), "mismatch vs reference"

    print("KERNEL_OK")
</pallas_src>

<mosaic_0001>
module attributes {stable_mosaic.version = 11 : i64} {
  func.func @_mha_fused_kernel(%arg0: i32, %arg1: memref<64x128xf32, #tpu.memory_space<vmem>>, %arg2: memref<128x384xbf16, #tpu.memory_space<vmem>>, %arg3: memref<128x128xbf16, #tpu.memory_space<vmem>>, %arg4: memref<1x128xf32, #tpu.memory_space<vmem>>, %arg5: memref<64x128xf32, #tpu.memory_space<vmem>>) attributes {dimension_semantics = [#tpu.dimension_semantics<parallel>], iteration_bounds = array<i64: 2>, scalar_prefetch = 0 : i64, scratch_operands = 0 : i64, tpu.core_type = #tpu.core_type<tc>, window_params = [{transform_indices = @transform_0, window_bounds = array<i64: 64, 128>}, {pipeline_mode = #tpu.pipeline_mode<synchronous>, transform_indices = @transform_1, window_bounds = array<i64: 128, 384>}, {pipeline_mode = #tpu.pipeline_mode<synchronous>, transform_indices = @transform_2, window_bounds = array<i64: 128, 128>}, {pipeline_mode = #tpu.pipeline_mode<synchronous>, transform_indices = @transform_3, window_bounds = array<i64: 1, 128>}, {transform_indices = @transform_4, window_bounds = array<i64: 64, 128>}]} {
    %c0 = arith.constant 0 : index
    %c0_0 = arith.constant 0 : index
    %0 = vector.load %arg1[%c0, %c0_0] : memref<64x128xf32, #tpu.memory_space<vmem>>, vector<64x128xf32>
    %1 = arith.truncf %0 : vector<64x128xf32> to vector<64x128xbf16>
    %c0_1 = arith.constant 0 : index
    %c0_2 = arith.constant 0 : index
    %2 = vector.load %arg2[%c0_1, %c0_2] : memref<128x384xbf16, #tpu.memory_space<vmem>>, vector<128x384xbf16>
    %cst = arith.constant dense<0.000000e+00> : vector<64x384xf32>
    %3 = tpu.matmul %1, %2, %cst {dimension_numbers = #tpu.dot_dimension_numbers<[1], [0], [0], [1], [0, 0, 1, 1], [], []>} : vector<64x128xbf16>, vector<128x384xbf16>, vector<64x384xf32> -> vector<64x384xf32>
    %4 = arith.truncf %3 : vector<64x384xf32> to vector<64x384xbf16>
    %5 = tpu.iota {dimensions = array<i32: 0>} : vector<32x32xi32>
    %6 = tpu.iota {dimensions = array<i32: 1>} : vector<32x32xi32>
    %7 = arith.cmpi sle, %6, %5 : vector<32x32xi32>
    %8 = vector.extract_strided_slice %4 {offsets = [0, 0], sizes = [64, 32], strides = [1, 1]} : vector<64x384xbf16> to vector<64x32xbf16>
    %9 = vector.shape_cast %8 : vector<64x32xbf16> to vector<2x32x32xbf16>
    %10 = vector.extract_strided_slice %4 {offsets = [0, 128], sizes = [64, 32], strides = [1, 1]} : vector<64x384xbf16> to vector<64x32xbf16>
    %11 = vector.shape_cast %10 : vector<64x32xbf16> to vector<2x32x32xbf16>
    %12 = vector.extract_strided_slice %4 {offsets = [0, 256], sizes = [64, 32], strides = [1, 1]} : vector<64x384xbf16> to vector<64x32xbf16>
    %13 = vector.shape_cast %12 : vector<64x32xbf16> to vector<2x32x32xbf16>
    "tpu.trace_start"() <{level = 10 : i32, message = "btd,bsd->bts"}> : () -> ()
    %cst_3 = arith.constant dense<0.000000e+00> : vector<2x32x32xf32>
    %14 = tpu.matmul %9, %11, %cst_3 {dimension_numbers = #tpu.dot_dimension_numbers<[2], [2], [1], [1], [0, 0, 0, 1, 1, 1], [0], [0]>} : vector<2x32x32xbf16>, vector<2x32x32xbf16>, vector<2x32x32xf32> -> vector<2x32x32xf32>
    %cst_4 = arith.constant -1.000000e+30 : f32
    "tpu.trace_stop"() : () -> ()
    %15 = vector.shape_cast %7 : vector<32x32xi1> to vector<1x32x32xi1>
    %16 = vector.broadcast %15 : vector<1x32x32xi1> to vector<2x32x32xi1>
    %17 = vector.broadcast %cst_4 : f32 to vector<2x32x32xf32>
    %18 = arith.select %16, %14, %17 : vector<2x32x32xi1>, vector<2x32x32xf32>
    %cst_5 = arith.constant dense<0xFF800000> : vector<2x32xf32>
    %19 = vector.multi_reduction <maximumf>, %18, %cst_5 [2] : vector<2x32x32xf32> to vector<2x32xf32>
    %20 = vector.shape_cast %19 : vector<2x32xf32> to vector<2x32x1xf32>
    %21 = vector.broadcast %20 : vector<2x32x1xf32> to vector<2x32x32xf32>
    %22 = arith.subf %18, %21 : vector<2x32x32xf32>
    %23 = math.exp %22 : vector<2x32x32xf32>
    %cst_6 = arith.constant dense<0.000000e+00> : vector<2x32xf32>
    %24 = vector.multi_reduction <add>, %23, %cst_6 [2] : vector<2x32x32xf32> to vector<2x32xf32>
    %25 = vector.shape_cast %24 : vector<2x32xf32> to vector<2x32x1xf32>
    %26 = tpu.reciprocal %25 {approx = true} : vector<2x32x1xf32> -> vector<2x32x1xf32>
    %27 = vector.broadcast %26 : vector<2x32x1xf32> to vector<2x32x32xf32>
    %28 = arith.mulf %23, %27 : vector<2x32x32xf32>
    %29 = arith.truncf %28 : vector<2x32x32xf32> to vector<2x32x32xbf16>
    "tpu.trace_start"() <{level = 10 : i32, message = "bts,bsd->btd"}> : () -> ()
    %cst_7 = arith.constant dense<0.000000e+00> : vector<2x32x32xf32>
    %30 = tpu.matmul %29, %13, %cst_7 {dimension_numbers = #tpu.dot_dimension_numbers<[2], [1], [1], [2], [0, 0, 0, 1, 1, 2], [0], [0]>} : vector<2x32x32xbf16>, vector<2x32x32xbf16>, vector<2x32x32xf32> -> vector<2x32x32xf32>
    "tpu.trace_stop"() : () -> ()
    %31 = vector.extract_strided_slice %4 {offsets = [0, 32], sizes = [64, 32], strides = [1, 1]} : vector<64x384xbf16> to vector<64x32xbf16>
    %32 = vector.shape_cast %31 : vector<64x32xbf16> to vector<2x32x32xbf16>
    %33 = vector.extract_strided_slice %4 {offsets = [0, 160], sizes = [64, 32], strides = [1, 1]} : vector<64x384xbf16> to vector<64x32xbf16>
    %34 = vector.shape_cast %33 : vector<64x32xbf16> to vector<2x32x32xbf16>
    %35 = vector.extract_strided_slice %4 {offsets = [0, 288], sizes = [64, 32], strides = [1, 1]} : vector<64x384xbf16> to vector<64x32xbf16>
    %36 = vector.shape_cast %35 : vector<64x32xbf16> to vector<2x32x32xbf16>
    "tpu.trace_start"() <{level = 10 : i32, message = "btd,bsd->bts"}> : () -> ()
    %cst_8 = arith.constant dense<0.000000e+00> : vector<2x32x32xf32>
    %37 = tpu.matmul %32, %34, %cst_8 {dimension_numbers = #tpu.dot_dimension_numbers<[2], [2], [1], [1], [0, 0, 0, 1, 1, 1], [0], [0]>} : vector<2x32x32xbf16>, vector<2x32x32xbf16>, vector<2x32x32xf32> -> vector<2x32x32xf32>
    %cst_9 = arith.constant -1.000000e+30 : f32
    "tpu.trace_stop"() : () -> ()
    %38 = vector.shape_cast %7 : vector<32x32xi1> to vector<1x32x32xi1>
    %39 = vector.broadcast %38 : vector<1x32x32xi1> to vector<2x32x32xi1>
    %40 = vector.broadcast %cst_9 : f32 to vector<2x32x32xf32>
    %41 = arith.select %39, %37, %40 : vector<2x32x32xi1>, vector<2x32x32xf32>
    %cst_10 = arith.constant dense<0xFF800000> : vector<2x32xf32>
    %42 = vector.multi_reduction <maximumf>, %41, %cst_10 [2] : vector<2x32x32xf32> to vector<2x32xf32>
    %43 = vector.shape_cast %42 : vector<2x32xf32> to vector<2x32x1xf32>
    %44 = vector.broadcast %43 : vector<2x32x1xf32> to vector<2x32x32xf32>
    %45 = arith.subf %41, %44 : vector<2x32x32xf32>
    %46 = math.exp %45 : vector<2x32x32xf32>
    %cst_11 = arith.constant dense<0.000000e+00> : vector<2x32xf32>
    %47 = vector.multi_reduction <add>, %46, %cst_11 [2] : vector<2x32x32xf32> to vector<2x32xf32>
    %48 = vector.shape_cast %47 : vector<2x32xf32> to vector<2x32x1xf32>
    %49 = tpu.reciprocal %48 {approx = true} : vector<2x32x1xf32> -> vector<2x32x1xf32>
    %50 = vector.broadcast %49 : vector<2x32x1xf32> to vector<2x32x32xf32>
    %51 = arith.mulf %46, %50 : vector<2x32x32xf32>
    %52 = arith.truncf %51 : vector<2x32x32xf32> to vector<2x32x32xbf16>
    "tpu.trace_start"() <{level = 10 : i32, message = "bts,bsd->btd"}> : () -> ()
    %cst_12 = arith.constant dense<0.000000e+00> : vector<2x32x32xf32>
    %53 = tpu.matmul %52, %36, %cst_12 {dimension_numbers = #tpu.dot_dimension_numbers<[2], [1], [1], [2], [0, 0, 0, 1, 1, 2], [0], [0]>} : vector<2x32x32xbf16>, vector<2x32x32xbf16>, vector<2x32x32xf32> -> vector<2x32x32xf32>
    "tpu.trace_stop"() : () -> ()
    %54 = vector.extract_strided_slice %4 {offsets = [0, 64], sizes = [64, 32], strides = [1, 1]} : vector<64x384xbf16> to vector<64x32xbf16>
    %55 = vector.shape_cast %54 : vector<64x32xbf16> to vector<2x32x32xbf16>
    %56 = vector.extract_strided_slice %4 {offsets = [0, 192], sizes = [64, 32], strides = [1, 1]} : vector<64x384xbf16> to vector<64x32xbf16>
    %57 = vector.shape_cast %56 : vector<64x32xbf16> to vector<2x32x32xbf16>
    %58 = vector.extract_strided_slice %4 {offsets = [0, 320], sizes = [64, 32], strides = [1, 1]} : vector<64x384xbf16> to vector<64x32xbf16>
    %59 = vector.shape_cast %58 : vector<64x32xbf16> to vector<2x32x32xbf16>
    "tpu.trace_start"() <{level = 10 : i32, message = "btd,bsd->bts"}> : () -> ()
    %cst_13 = arith.constant dense<0.000000e+00> : vector<2x32x32xf32>
    %60 = tpu.matmul %55, %57, %cst_13 {dimension_numbers = #tpu.dot_dimension_numbers<[2], [2], [1], [1], [0, 0, 0, 1, 1, 1], [0], [0]>} : vector<2x32x32xbf16>, vector<2x32x32xbf16>, vector<2x32x32xf32> -> vector<2x32x32xf32>
    %cst_14 = arith.constant -1.000000e+30 : f32
    "tpu.trace_stop"() : () -> ()
    %61 = vector.shape_cast %7 : vector<32x32xi1> to vector<1x32x32xi1>
    %62 = vector.broadcast %61 : vector<1x32x32xi1> to vector<2x32x32xi1>
    %63 = vector.broadcast %cst_14 : f32 to vector<2x32x32xf32>
    %64 = arith.select %62, %60, %63 : vector<2x32x32xi1>, vector<2x32x32xf32>
    %cst_15 = arith.constant dense<0xFF800000> : vector<2x32xf32>
    %65 = vector.multi_reduction <maximumf>, %64, %cst_15 [2] : vector<2x32x32xf32> to vector<2x32xf32>
    %66 = vector.shape_cast %65 : vector<2x32xf32> to vector<2x32x1xf32>
    %67 = vector.broadcast %66 : vector<2x32x1xf32> to vector<2x32x32xf32>
    %68 = arith.subf %64, %67 : vector<2x32x32xf32>
    %69 = math.exp %68 : vector<2x32x32xf32>
    %cst_16 = arith.constant dense<0.000000e+00> : vector<2x32xf32>
    %70 = vector.multi_reduction <add>, %69, %cst_16 [2] : vector<2x32x32xf32> to vector<2x32xf32>
    %71 = vector.shape_cast %70 : vector<2x32xf32> to vector<2x32x1xf32>
    %72 = tpu.reciprocal %71 {approx = true} : vector<2x32x1xf32> -> vector<2x32x1xf32>
    %73 = vector.broadcast %72 : vector<2x32x1xf32> to vector<2x32x32xf32>
    %74 = arith.mulf %69, %73 : vector<2x32x32xf32>
    %75 = arith.truncf %74 : vector<2x32x32xf32> to vector<2x32x32xbf16>
    "tpu.trace_start"() <{level = 10 : i32, message = "bts,bsd->btd"}> : () -> ()
    %cst_17 = arith.constant dense<0.000000e+00> : vector<2x32x32xf32>
    %76 = tpu.matmul %75, %59, %cst_17 {dimension_numbers = #tpu.dot_dimension_numbers<[2], [1], [1], [2], [0, 0, 0, 1, 1, 2], [0], [0]>} : vector<2x32x32xbf16>, vector<2x32x32xbf16>, vector<2x32x32xf32> -> vector<2x32x32xf32>
    "tpu.trace_stop"() : () -> ()
    %77 = vector.extract_strided_slice %4 {offsets = [0, 96], sizes = [64, 32], strides = [1, 1]} : vector<64x384xbf16> to vector<64x32xbf16>
    %78 = vector.shape_cast %77 : vector<64x32xbf16> to vector<2x32x32xbf16>
    %79 = vector.extract_strided_slice %4 {offsets = [0, 224], sizes = [64, 32], strides = [1, 1]} : vector<64x384xbf16> to vector<64x32xbf16>
    %80 = vector.shape_cast %79 : vector<64x32xbf16> to vector<2x32x32xbf16>
    %81 = vector.extract_strided_slice %4 {offsets = [0, 352], sizes = [64, 32], strides = [1, 1]} : vector<64x384xbf16> to vector<64x32xbf16>
    %82 = vector.shape_cast %81 : vector<64x32xbf16> to vector<2x32x32xbf16>
    "tpu.trace_start"() <{level = 10 : i32, message = "btd,bsd->bts"}> : () -> ()
    %cst_18 = arith.constant dense<0.000000e+00> : vector<2x32x32xf32>
    %83 = tpu.matmul %78, %80, %cst_18 {dimension_numbers = #tpu.dot_dimension_numbers<[2], [2], [1], [1], [0, 0, 0, 1, 1, 1], [0], [0]>} : vector<2x32x32xbf16>, vector<2x32x32xbf16>, vector<2x32x32xf32> -> vector<2x32x32xf32>
    %cst_19 = arith.constant -1.000000e+30 : f32
    "tpu.trace_stop"() : () -> ()
    %84 = vector.shape_cast %7 : vector<32x32xi1> to vector<1x32x32xi1>
    %85 = vector.broadcast %84 : vector<1x32x32xi1> to vector<2x32x32xi1>
    %86 = vector.broadcast %cst_19 : f32 to vector<2x32x32xf32>
    %87 = arith.select %85, %83, %86 : vector<2x32x32xi1>, vector<2x32x32xf32>
    %cst_20 = arith.constant dense<0xFF800000> : vector<2x32xf32>
    %88 = vector.multi_reduction <maximumf>, %87, %cst_20 [2] : vector<2x32x32xf32> to vector<2x32xf32>
    %89 = vector.shape_cast %88 : vector<2x32xf32> to vector<2x32x1xf32>
    %90 = vector.broadcast %89 : vector<2x32x1xf32> to vector<2x32x32xf32>
    %91 = arith.subf %87, %90 : vector<2x32x32xf32>
    %92 = math.exp %91 : vector<2x32x32xf32>
    %cst_21 = arith.constant dense<0.000000e+00> : vector<2x32xf32>
    %93 = vector.multi_reduction <add>, %92, %cst_21 [2] : vector<2x32x32xf32> to vector<2x32xf32>
    %94 = vector.shape_cast %93 : vector<2x32xf32> to vector<2x32x1xf32>
    %95 = tpu.reciprocal %94 {approx = true} : vector<2x32x1xf32> -> vector<2x32x1xf32>
    %96 = vector.broadcast %95 : vector<2x32x1xf32> to vector<2x32x32xf32>
    %97 = arith.mulf %92, %96 : vector<2x32x32xf32>
    %98 = arith.truncf %97 : vector<2x32x32xf32> to vector<2x32x32xbf16>
    "tpu.trace_start"() <{level = 10 : i32, message = "bts,bsd->btd"}> : () -> ()
    %cst_22 = arith.constant dense<0.000000e+00> : vector<2x32x32xf32>
    %99 = tpu.matmul %98, %82, %cst_22 {dimension_numbers = #tpu.dot_dimension_numbers<[2], [1], [1], [2], [0, 0, 0, 1, 1, 2], [0], [0]>} : vector<2x32x32xbf16>, vector<2x32x32xbf16>, vector<2x32x32xf32> -> vector<2x32x32xf32>
    "tpu.trace_stop"() : () -> ()
    %100 = tpu.concatenate %30, %53, %76, %99 in 2 : vector<2x32x32xf32>, vector<2x32x32xf32>, vector<2x32x32xf32>, vector<2x32x32xf32> -> vector<2x32x128xf32>
    %101 = vector.shape_cast %100 : vector<2x32x128xf32> to vector<64x128xf32>
    %102 = arith.truncf %101 : vector<64x128xf32> to vector<64x128xbf16>
    %c0_23 = arith.constant 0 : index
    %c0_24 = arith.constant 0 : index
    %103 = vector.load %arg3[%c0_23, %c0_24] : memref<128x128xbf16, #tpu.memory_space<vmem>>, vector<128x128xbf16>
    %cst_25 = arith.constant dense<0.000000e+00> : vector<64x128xf32>
    %104 = tpu.matmul %102, %103, %cst_25 {dimension_numbers = #tpu.dot_dimension_numbers<[1], [0], [0], [1], [0, 0, 1, 1], [], []>} : vector<64x128xbf16>, vector<128x128xbf16>, vector<64x128xf32> -> vector<64x128xf32>
    %c0_26 = arith.constant 0 : index
    %c0_27 = arith.constant 0 : index
    %105 = vector.load %arg4[%c0_26, %c0_27] : memref<1x128xf32, #tpu.memory_space<vmem>>, vector<1x128xf32>
    %106 = vector.broadcast %105 : vector<1x128xf32> to vector<64x128xf32>
    %107 = arith.addf %104, %106 : vector<64x128xf32>
    %c0_28 = arith.constant 0 : index
    %c0_29 = arith.constant 0 : index
    %108 = vector.load %arg5[%c0_28, %c0_29] : memref<64x128xf32, #tpu.memory_space<vmem>>, vector<64x128xf32>
    tpu.vector_store %arg5[%c0_28, %c0_29], %107 {strides = array<i32>} : memref<64x128xf32, #tpu.memory_space<vmem>>, vector<64x128xf32>,
    return
  }
  func.func @transform_0(%arg0: i32) -> (i32, i32) {
    %c0_i32 = arith.constant 0 : i32
    %c0_i32_0 = arith.constant 0 : i32
    return %arg0, %c0_i32 : i32, i32
  }
  func.func @transform_1(%arg0: i32) -> (i32, i32) {
    %c0_i32 = arith.constant 0 : i32
    %c0_i32_0 = arith.constant 0 : i32
    %c0_i32_1 = arith.constant 0 : i32
    return %c0_i32, %c0_i32_0 : i32, i32
  }
  func.func @transform_2(%arg0: i32) -> (i32, i32) {
    %c0_i32 = arith.constant 0 : i32
    %c0_i32_0 = arith.constant 0 : i32
    %c0_i32_1 = arith.constant 0 : i32
    return %c0_i32, %c0_i32_0 : i32, i32
  }
  func.func @transform_3(%arg0: i32) -> (i32, i32) {
    %c0_i32 = arith.constant 0 : i32
    %c0_i32_0 = arith.constant 0 : i32
    %c0_i32_1 = arith.constant 0 : i32
    return %c0_i32, %c0_i32_0 : i32, i32
  }
  func.func @transform_4(%arg0: i32) -> (i32, i32) {
    %c0_i32 = arith.constant 0 : i32
    %c0_i32_0 = arith.constant 0 : i32
    return %arg0, %c0_i32 : i32, i32
  }
}

</mosaic_0001>

<bundles_post_ra>
// kernel: tpu_custom_call.1
= control target key start
LH: loop header
LB: loop body
LE: loop exit
PB: predicated region body
PF: predicated region fallthrough
CT: control target
= control target key end

     0   :  { %9 = vsyncpa [#allocation3], 0  ;;  %s4064_s0 = inlined_call_operand.hbm [shape: f32[128,128], index: 0, kind: input, shape index: {}]   ;;  %s4065_s1 = inlined_call_operand.hbm [shape: bf16[128,384], index: 1, kind: input, shape index: {}]   ;;  %s4066_s2 = inlined_call_operand.hbm [shape: bf16[128,128], index: 2, kind: input, shape index: {}]   ;;  %s4067_s3 = inlined_call_operand.vmem [shape: f32[1,128], index: 3, kind: input, shape index: {}]   ;;  %s4068_s4 = inlined_call_operand.hbm [shape: f32[128,128], index: 4, kind: output, shape index: {}]  }
   0x1   :  { %11 = vsyncpa [#allocation3 + $0x1], 0 }
   0x2   :  { %12 = vsyncpa [#allocation6], 0 }
   0x3   :  { %13 = vsyncpa [#allocation4], 0 }
   0x4   :  { %15 = vsyncpa [#allocation4 + $0x1], 0  ;;  %s3261_s15 = smov 0   ;;  %s3263_s16 = smov 0  }
   0x5   :  { %s3265_s17 = smov 0   ;;  %s3267_s18 = smov 0  }
   0x6 LB: > { %s3282_s19 = sadd.s32 4294967295, %s3218_s18   ;;  %s2390_s20 = sadd.s32 4294967294, %s3218_s18   ;;  %s3218_s18 = sphi %s3267_s18, %s4096_s18   ;;  %s3214_s17 = sphi %s3265_s17, %s4095_s17   ;;  %s3210_s16 = sphi %s3263_s16, %s4094_s16   ;;  %s3206_s15 = sphi %s3261_s15, %s4093_s15  }
   0x7   : > { %p41_p0 = scmp.ne.s32.totalorder %s3210_s16, %s3206_s15  ;;  %p4069_p1 = scmp.eq.s32.totalorder %s3282_s19, 0 }
   0x8   : > { %p134_p3 = scmp.eq.s32.totalorder %s2390_s20, 1  ;;  %p2391_p5 = scmp.ge.s32.totalorder %s3218_s18, 1 }
   0x9   : > { %p3291_p4 = por %p4069_p1, %p41_p0  ;;  %p141_p7 = scmp.lt.s32.totalorder %s3218_s18, 3 }
   0xa   : > { %p3296_p6 = por %p134_p3, %p41_p0  ;;  %s3220_s24 = smov [#allocation5]  }
   0xb   : > { %s4072_s21 = scalar_select %p3291_p4, 1, 0 }
   0xc   : > { %s4073_s22 = scalar_select %p3296_p6, 1, 0 }
   0xd   : > { %p3301_p8 = pnand %p2391_p5, %p141_p7  ;;  %s153_s25 = sshll.u32 %s3220_s24, 4  ;;  %s3305_s25 = int_to_ptr.vmem [resolvable:$true] %s153_s25 }
   0xe   : > { %s3221_s27 = smov [#allocation7]   ;;  %s3062_s5 = scalar_lea.hbm %s4065_s1, 3072 }
   0xf   : > { %p2767_p9 = pneg %p3301_p8  ;;  %s166_s28 = sshll.u32 %s3221_s27, 4  ;;  %s3316_s28 = int_to_ptr.vmem [resolvable:$true] %s166_s28 }
  0x10   : > { %p3063_p12 = scmp.ne.s32.totalorder %s4065_s1, %s3062_s5  ;;  %p3069_p5 = scmp.lt.u32.totalorder %s3062_s5, %s4065_s1 }
  0x11   : > { %p3312_p11 = pnand %p2767_p9, %p4069_p1 }
  0x13   : > { %p3064_p13 = pneg %p3312_p11 }
  0x15   : > { %p3065_p0 = pnand %p3064_p13, %p3063_p12 }
  0x17   : > { %p3066_p3 = pneg %p3065_p0 }
  0x19   : > { %p3071_p7 = pnand %p3069_p5, %p3066_p3 }
  0x1b   : > { %3074 = shalt.err (!%p3071_p7)
}
  0x1c   : > { %s3075_s10 = scalar_lea.vmem %s3305_s25, 3072  ;;  %p3083_p2 = scmp.lt.s32.totalorder %s3305_s25, %s3305_s25 }
  0x1d   : > { %p3076_p9 = scmp.ne.s32.totalorder %s3305_s25, %s3075_s10  ;;  %p3084_p12 = scmp.lt.s32.totalorder %s3075_s10, %s3075_s10 }
  0x1f   : > { %p3078_p10 = pnand %p3076_p9, %p3064_p13  ;;  %p3085_p0 = por %p3084_p12, %p3083_p2 }
  0x21   : > { %p3079_p1 = pneg %p3078_p10 }
  0x23   : > { %p3086_p6 = pnand %p3085_p0, %p3079_p1 }
  0x25   : > { %3089 = shalt.err (!%p3086_p6)
}
  0x26   : > { %s3222_s11 = smov 192   ;;  %s3223_s12 = smov 12  }
  0x27   : > { %2770 = dma.hbm_to_vmem [thread:$0]  (!%p3312_p11), %s4065_s1, 3072, %s3305_s25, [#allocation6], %s3222_s11, %s3222_s11, %s3223_s12  }
  0x28   : > { %s3090_s27 = scalar_lea.hbm %s4066_s2, 1024 }
  0x29   : > { %p3091_p2 = scmp.ne.s32.totalorder %s4066_s2, %s3090_s27  ;;  %p3097_p10 = scmp.lt.u32.totalorder %s3090_s27, %s4066_s2 }
  0x2b   : > { %p3093_p1 = pnand %p3091_p2, %p3064_p13 }
  0x2d   : > { %p3094_p6 = pneg %p3093_p1 }
  0x2f   : > { %p3099_p3 = pnand %p3097_p10, %p3094_p6 }
  0x31   : > { %3102 = shalt.err (!%p3099_p3)
}
  0x32   : > { %s3103_s25 = scalar_lea.vmem %s3316_s28, 1024  ;;  %p3111_p12 = scmp.lt.s32.totalorder %s3316_s28, %s3316_s28 }
  0x33   : > { %p3104_p5 = scmp.ne.s32.totalorder %s3316_s28, %s3103_s25  ;;  %p3112_p0 = scmp.lt.s32.totalorder %s3103_s25, %s3103_s25 }
  0x35   : > { %p3106_p7 = pnand %p3104_p5, %p3064_p13  ;;  %p3113_p2 = por %p3112_p0, %p3111_p12 }
  0x37   : > { %p3107_p9 = pneg %p3106_p7 }
  0x39   : > { %p3114_p1 = pnand %p3113_p2, %p3107_p9 }
  0x3b   : > { %3117 = shalt.err (!%p3114_p1)
}
  0x3c   : > { %s3224_s7 = smov 64   ;;  %s3225_s8 = smov 4  }
  0x3d   : > { %2773 = dma.hbm_to_vmem [thread:$0]  (!%p3312_p11), %s4066_s2, 1024, %s3316_s28, [#allocation6], %s3224_s7, %s3224_s7, %s3225_s8  }
  0x3e   : > { %s3371_s11 = sadd.s32 1, %s3218_s18   ;;  %s28_s13 = sadd.s32 1, %s3214_s17 }
  0x3f   : > { %s25_s12 = ssub.s32 %s3218_s18, %s3371_s11  ;;  %p35_p6 = scmp.ne.s32.totalorder %s3214_s17, %s3210_s16 }
  0x40   : > { %p26_p13 = scmp.eq.s32.totalorder %s25_s12, 0  ;;  %p36_p10 = scmp.eq.s32.totalorder %s3218_s18, 0 }
  0x41   : > { %p4076_p5 = scmp.eq.s32.totalorder %s3282_s19, 1  ;;  %p2784_p9 = scmp.lt.s32.totalorder %s3218_s18, 2 }
  0x42   : > { %s3380_s14 = scalar_select %p26_p13, %s3214_s17, %s28_s13  }
  0x43   : > { %p37_p3 = por %p36_p10, %p35_p6  ;;  %p3384_p7 = por %p4076_p5, %p35_p6 }
  0x44   : > { %s183_s26 = sand.u32 1, %s3214_s17   ;;  %s2473_s28 = sshll.u32 %s3218_s18, 10 }
  0x45   : > { %s4077_s20 = scalar_select %p3384_p7, 1, 0 }
  0x46   : > { %s2395_s24 = sshll.u32 %s183_s26, 6  ;;  %s3394_s30 = scalar_lea.hbm %s4064_s0, %s2473_s28 }
  0x47   : > { %s187_s5 = scalar_lea.vmem [#allocation2], %s2395_s24  ;;  %p3398_p11 = pnand %p2784_p9, %p37_p3 }
  0x48   : > { %s194_s6 = sshll.u32 %s187_s5, 4  ;;  %s3402_s7 = scalar_lea.sflag [#allocation3], %s183_s26  ;;  %s3396_s6 = int_to_ptr.vmem [resolvable:$true] %s194_s6 }
  0x49   : > { %s3118_s8 = scalar_lea.hbm %s3394_s30, 1024  ;;  %p3120_p0 = pneg %p3398_p11 }
  0x4a   : > { %p3119_p12 = scmp.ne.s32.totalorder %s3394_s30, %s3118_s8  ;;  %s3123_s12 = scalar_lea.hbm %s4064_s0, 2048 }
  0x4b   : > { %p3124_p13 = scmp.lt.u32.totalorder %s3394_s30, %s4064_s0  ;;  %p3125_p6 = scmp.lt.u32.totalorder %s3123_s12, %s3118_s8 }
  0x4c   : > { %p3121_p2 = pnand %p3120_p0, %p3119_p12  ;;  %p3127_p3 = scmp.lt.u32.totalorder %s3118_s8, %s3394_s30 }
  0x4d   : > { %p3126_p10 = por %p3125_p6, %p3124_p13 }
  0x4e   : > { %p3122_p1 = pneg %p3121_p2 }
  0x4f   : > { %p3128_p5 = por %p3127_p3, %p3126_p10 }
  0x51   : > { %p3129_p9 = pnand %p3128_p5, %p3122_p1 }
  0x53   : > { %3132 = shalt.err (!%p3129_p9)
}
  0x54   : > { %s3133_s26 = scalar_lea.vmem %s3396_s6, 1024  ;;  %s3226_s28 = smov [#allocation2]  }
  0x55   : > { %p3134_p12 = scmp.ne.s32.totalorder %s3396_s6, %s3133_s26  ;;  %s3138_s27 = sshll.u32 %s3226_s28, 4  ;;  %s3139_s27 = int_to_ptr.vmem [resolvable:$false] %s3138_s27 }
  0x56   : > { %s3140_s29 = scalar_lea.vmem %s3139_s27, 2048  ;;  %p3141_p4 = scmp.lt.s32.totalorder %s3396_s6, %s3139_s27 }
  0x57   : > { %p3136_p2 = pnand %p3134_p12, %p3120_p0  ;;  %p3142_p13 = scmp.lt.s32.totalorder %s3140_s29, %s3133_s26 }
  0x59   : > { %p3137_p7 = pneg %p3136_p2  ;;  %p3143_p6 = por %p3142_p13, %p3141_p4 }
  0x5b   : > { %p3144_p10 = pnand %p3143_p6, %p3137_p7 }
  0x5d   : > { %3147 = shalt.err (!%p3144_p10)
}
  0x5e   : > { %s3227_s5 = smov 128   ;;  %s3228_s8 = smov 8  }
  0x5f   : > { %2777 = dma.hbm_to_vmem [thread:$0]  (!%p3398_p11), %s3394_s30, 1024, %s3396_s6, %s3402_s7, %s3227_s5, %s3227_s5, %s3228_s8  }
  0x60   : > { %206 = sbr.rel (%p3301_p8) target bundleno = 3325 (0xcfd), region = 36  ;;  %s3433_s9 = sand.u32 (!%p3301_p8), 1, %s3210_s16  }
  0x61   : > { %s2399_s10 = sshll.u32 (!%p3301_p8), %s3433_s9, 6  ;;  %s209_s12 = scalar_lea.sflag (!%p3301_p8), [#allocation3], %s3433_s9 }
  0x62   : > { %s3439_s13 = scalar_lea.vmem (!%p3301_p8), [#allocation2], %s2399_s10  ;;  %p4079_p4 = scmp.ne.s32.totalorder (!%p3301_p8), %s4072_s21, 0 }
  0x67   : > { %3193 = dma.done.wait (%p4079_p4), %s209_s12, 1024  }
  0x68   : > { %3195 = vsyncadd (%p4079_p4), %s209_s12, 4294966272  ;;  %p4080_p7 = scmp.eq.s32.totalorder %s3282_s19, 0 }
  0x6a   : > { %3197 = dma.done.wait (%p4080_p7), [#allocation6], 4096   ;;  %p4081_p8 = pmov %p4080_p7 }
  0x6b   : > { %v3229_v0 = vmov 0   ;;  %v2894_v1 = vld [vmem:[#allocation5 + $0x4] ss:$12 sps:$4 sm:$0xff]   ;;  %v2896_v2 = vld [vmem:[#allocation5] ss:$12 sps:$4 sm:$0xff]   ;;  %v251_v28 = vld [vmem:[%s3439_s13 + $0x18] sm:$0xff] }
  0x6c   : > { %3199 = vsyncadd (%p4081_p8), [#allocation6], 4294963200  ;;  %452 = vmatprep.mubr.bf16.mxu0 %v3229_v0  ;;  %420 = vmatprep.subr.bf16.mxu0 %v2894_v1  ;;  %v2897_v3 = vld [vmem:[#allocation5 + $0x1c] ss:$12 sps:$4 sm:$0xff]   ;;  %v2899_v4 = vld [vmem:[#allocation5 + $0x18] ss:$12 sps:$4 sm:$0xff]  }
  0x6d   : > { %421 = vmatpush1.bf16.msra.mxu0 %v2896_v2  ;;  %v2900_v5 = vld [vmem:[#allocation5 + $0x34] ss:$12 sps:$4 sm:$0xff]   ;;  %v2902_v6 = vld [vmem:[#allocation5 + $0x30] ss:$12 sps:$4 sm:$0xff]   ;;  %v2903_v7 = vld [vmem:[#allocation5 + $0x4c] ss:$12 sps:$4 sm:$0xff]  }
  0x6e   : > { %422 = vmatprep.subr.bf16.mxu0 %v2897_v3  ;;  %v248_v8 = vld [vmem:[%s3439_s13] sm:$0xff]  ;;  %v2905_v9 = vld [vmem:[#allocation5 + $0x48] ss:$12 sps:$4 sm:$0xff]   ;;  %v2914_v20 = vld [vmem:[#allocation5 + $0x90] ss:$12 sps:$4 sm:$0xff]   ;;  %vm581_vm0 = vcmask 261120  }
  0x6f   : > { %v249_v10 = vld [vmem:[%s3439_s13 + $0x8] sm:$0xff]  ;;  %v2906_v11 = vld [vmem:[#allocation5 + $0x64] ss:$12 sps:$4 sm:$0xff]   ;;  %v2912_v19 = vld [vmem:[#allocation5 + $0x94] ss:$12 sps:$4 sm:$0xff]   ;;  %s3230_s21 = smov 96  }
  0x70   : > { %v256_v12 = vpack.c.bf16 %v249_v10, %v248_v8  ;;  %v2908_v13 = vld [vmem:[#allocation5 + $0x60] ss:$12 sps:$4 sm:$0xff]   ;;  %v2918_v14 = vld [vmem:[#allocation5 + $0x8] ss:$12 sps:$4 sm:$0xff]   ;;  %v2920_v17 = vld [vmem:[#allocation5 + $0x38] ss:$12 sps:$4 sm:$0xff]  }
  0x71   : > { %423 = vmatpush1.bf16.msra.mxu0 %v2899_v4  ;;  %v2919_v15 = vld [vmem:[#allocation5 + $0x20] ss:$12 sps:$4 sm:$0xff]   ;;  %v2909_v16 = vld [vmem:[#allocation5 + $0x7c] ss:$12 sps:$4 sm:$0xff]   ;;  %2563 = vmatprep.subr.bf16.mxu1 %v2918_v14  ;;  %v2911_v18 = vld [vmem:[#allocation5 + $0x78] ss:$12 sps:$4 sm:$0xff]  }
  0x72   : > { %424 = vmatprep.subr.bf16.mxu0 %v2900_v5  ;;  %2579 = vmatprep.mubr.bf16.mxu1 %v256_v12  ;;  %v2921_v21 = vld [vmem:[#allocation5 + $0x50] ss:$12 sps:$4 sm:$0xff]   ;;  %v2915_v22 = vld [vmem:[#allocation5 + $0xac] ss:$12 sps:$4 sm:$0xff]   ;;  %v2922_v23 = vld [vmem:[#allocation5 + $0x68] ss:$12 sps:$4 sm:$0xff]  }
  0x73   : > { %2564 = vmatpush3.bf16.msra.mxu1 %v2918_v14  ;;  %v2917_v24 = vld [vmem:[#allocation5 + $0xa8] ss:$12 sps:$4 sm:$0xff]   ;;  %v2923_v25 = vld [vmem:[#allocation5 + $0x80] ss:$12 sps:$4 sm:$0xff]   ;;  %v2924_v26 = vld [vmem:[#allocation5 + $0x98] ss:$12 sps:$4 sm:$0xff]  }
  0x74   : > { %2565 = vmatprep.subr.bf16.mxu1 %v2919_v15  ;;  %v250_v27 = vld [vmem:[%s3439_s13 + $0x10] sm:$0xff]  ;;  %v252_v31 = vld [vmem:[%s3439_s13 + $0x20] sm:$0xff]  ;;  %v253_v32 = vld [vmem:[%s3439_s13 + $0x28] sm:$0xff]  ;;  %s3231_s23 = smov 64   ;;  %s3232_s30 = smov 32   ;;  %vm2118_vm5 = vcmask 523264  }
  0x75   : > { %425 = vmatpush1.bf16.msra.mxu0 %v2902_v6  ;;  %v257_v29 = vpack.c.bf16 %v251_v28, %v250_v27  ;;  %v2925_v30 = vld [vmem:[#allocation5 + $0xb0] ss:$12 sps:$4 sm:$0xff]   ;;  %v258_v33 = vpack.c.bf16 %v253_v32, %v252_v31  ;;  %vm2127_vm6 = vcmask 785408   ;;  %s244_s7 = scalar_lea.vmem [#allocation8], %s2399_s10  ;;  %s2474_s26 = sshll.u32 %s3282_s19, 10 }
  0x76   : > { %426 = vmatprep.subr.bf16.mxu0 %v2903_v7  ;;  %v254_v34 = vld [vmem:[%s3439_s13 + $0x30] sm:$0xff]  ;;  %v255_v35 = vld [vmem:[%s3439_s13 + $0x38] sm:$0xff]  ;;  %s2298_s24 = sshll.u32 %s244_s7, 4  ;;  %s4020_s29 = scalar_lea.hbm %s4068_s4, %s2474_s26  ;;  %s4015_s24 = int_to_ptr.vmem [resolvable:$true] %s2298_s24 }
  0x77   : > { %2566 = vmatpush3.bf16.msra.mxu1 %v2919_v15  ;;  %v259_v36 = vpack.c.bf16 %v255_v35, %v254_v34  ;;  %s2285_s19 = scalar_lea.sflag [#allocation4], %s3433_s9  ;;  %s3148_s5 = scalar_lea.vmem %s4015_s24, 1024 }
  0x78   : > { %2567 = vmatprep.subr.bf16.mxu1 %v2920_v17  ;;  %p3149_p11 = scmp.ne.s32.totalorder %s4015_s24, %s3148_s5  ;;  %p4090_p0 = scmp.ne.s32.totalorder %s4077_s20, 0 }
  0x79   : > { %427 = vmatpush1.bf16.msra.mxu0 %v2905_v9  ;;  %s3233_s8 = smov [#allocation8]  }
  0x7a   : > { %428 = vmatprep.subr.bf16.mxu0 %v2906_v11  ;;  %p3150_p1 = pnand %p3149_p11, %p4090_p0  ;;  %s3152_s10 = sshll.u32 %s3233_s8, 4  ;;  %s3153_s10 = int_to_ptr.vmem [resolvable:$false] %s3152_s10 }
  0x7b   : > { %2568 = vmatpush3.bf16.msra.mxu1 %v2920_v17  ;;  %s3154_s12 = scalar_lea.vmem %s3153_s10, 2048  ;;  %p3155_p5 = scmp.lt.s32.totalorder %s4015_s24, %s3153_s10 }
  0x7c   : > { %2569 = vmatprep.subr.bf16.mxu1 %v2921_v21  ;;  %p3151_p3 = pneg %p3150_p1  ;;  %p3156_p9 = scmp.lt.s32.totalorder %s3154_s12, %s3148_s5 }
  0x7d   : > { %429 = vmatpush1.bf16.msra.mxu0 %v2908_v13  ;;  %v570_v13 = vlaneseq }
  0x7e   : > { %430 = vmatprep.subr.bf16.mxu0 %v2909_v16  ;;  %p3157_p12 = por %p3156_p9, %p3155_p5 }
  0x7f   : > { %2570 = vmatpush3.bf16.msra.mxu1 %v2921_v21  ;;  %v571_v14 = vshrl.u32 %v570_v13, 7  ;;  %v576_v16 = vand.u32 127, %v570_v13 }
  0x80   : > { %2571 = vmatprep.subr.bf16.mxu1 %v2922_v23  ;;  %p3158_p2 = pnand %p3157_p12, %p3151_p3 }
  0x81   : > { %431 = vmatpush1.bf16.msra.mxu0 %v2911_v18  ;;  %v573_v15 = vadd.s32 16, %v571_v14  ;;  %v574_v17 = vadd.s32 24, %v571_v14  ;;  %v572_v18 = vadd.s32 8, %v571_v14  ;;  %vm3518_vm2 = vcmp.le.s32.totalorder %v576_v16, %v571_v14 }
  0x82   : > { %432 = vmatprep.subr.bf16.mxu0 %v2912_v19 }
  0x83   : > { %2572 = vmatpush3.bf16.msra.mxu1 %v2922_v23  ;;  %vm3514_vm1 = vcmp.le.s32.totalorder %v576_v16, %v573_v15  ;;  %vm3522_vm3 = vcmp.le.s32.totalorder %v576_v16, %v574_v17  ;;  %vm3528_vm4 = vcmp.le.s32.totalorder %v576_v16, %v572_v18 }
  0x84   : > { %2573 = vmatprep.subr.bf16.mxu1 %v2923_v25 }
  0x85   : > { %433 = vmatpush1.bf16.msra.mxu0 %v2914_v20 }
  0x86   : > { %434 = vmatprep.subr.bf16.mxu0 %v2915_v22 }
  0x87   : > { %2574 = vmatpush3.bf16.msra.mxu1 %v2923_v25 }
  0x88   : > { %2575 = vmatprep.subr.bf16.mxu1 %v2924_v26 }
  0x89   : > { %435 = vmatpush1.bf16.msra.mxu0 %v2917_v24 }
  0x8b   : > { %2576 = vmatpush3.bf16.msra.mxu1 %v2924_v26 }
  0x8c   : > { %453 = vmatmul.mubr.bf16.vlgmr.msra.gmra.mrb[0].mxu0 %v256_v12  ;;  %2577 = vmatprep.subr.bf16.mxu1 %v2925_v30 }
  0x8d   : > { %462 = vmatprep.mubr.bf16.mxu0 %v3229_v0 }
  0x8f   : > { %2578 = vmatpush3.bf16.msra.mxu1 %v2925_v30 }
  0x92   : > { %2580 = vmatmul.mubr.bf16.vlgmr.msra.gmra.mrb[0].mxu1 %v257_v29 }
  0x93   : > { %2583 = vmatprep.mubr.bf16.mxu1 %v258_v33 }
  0x94   : > { %463 = vmatmul.mubr.bf16.gmra.mrb[4].mxu0 %v257_v29 }
  0x95   : > { %472 = vmatprep.mubr.bf16.mxu0 %v3229_v0 }
  0x9a   : > { %2584 = vmatmul.mubr.bf16.gmra.mrb[4].mxu1 %v259_v36 }
  0x9c   : > { %473 = vmatmul.mubr.bf16.gmra.mrb[8].mxu0 %v258_v33 }
  0x9d   : > { %482 = vmatprep.mubr.bf16.mxu0 %v3229_v0 }
  0xa4   : > { %483 = vmatmul.mubr.bf16.gmra.mrb[12].mxu0 %v259_v36 }
 0x15f   : > { %v454_v37 = vpop.f32.mrb[0].mxu0 }
 0x160   : > { %v456_v38 = vpop.f32.mrb[1].mxu0 }
 0x161   : > { %v458_v39 = vpop.f32.mrb[2].mxu0 }
 0x162   : > { %v3461_v40 = vpack.c.bf16 %v458_v39, %v454_v37  ;;  %v460_v41 = vpop.f32.mrb[3].mxu0 }
 0x163   : > { %v3463_v42 = vpack.c.bf16 %v460_v41, %v456_v38 }
 0x164   : > { %2591 = vmatprep.mubr.msk.bf16.mxu1 %vm581_vm0, %v3461_v40 }
 0x165   : > { %2739 = vmatprep.subr.msk.bf16.mxu1 %vm581_vm0, %v3463_v42  ;;  %v589_v43 = vsel %vm581_vm0, %v3463_v42, 0  ;;  %v2581_v51 = vpop.f32.mrb[0].mxu1 }
 0x166   : > { %2588 = vmatpush3.bf16.xpose.msra.mxu1 %v589_v43  ;;  %v527_v52 = vpop.f32.mrb[1].mxu1 }
 0x167   : > { %v464_v44 = vpop.f32.mrb[4].mxu0  ;;  %v2582_v54 = vpop.f32.mrb[2].mxu1 }
 0x168   : > { %v466_v45 = vpop.f32.mrb[5].mxu0  ;;  %v3479_v56 = vpack.c.bf16 %v2582_v54, %v2581_v51  ;;  %v530_v57 = vpop.f32.mrb[3].mxu1 }
 0x169   : > { %v468_v46 = vpop.f32.mrb[6].mxu0  ;;  %v3481_v59 = vpack.c.bf16 %v530_v57, %v527_v52 }
 0x16a   : > { %v3471_v47 = vpack.c.bf16 %v468_v46, %v464_v44  ;;  %v470_v48 = vpop.f32.mrb[7].mxu0 }
 0x16b   : > { %v3473_v49 = vpack.c.bf16 %v470_v48, %v466_v45 }
 0x16d   : > { %2740 = vmatprep.subr.msk.bf16.mxu1 %vm581_vm0, %v3473_v49  ;;  %v592_v50 = vsel %vm581_vm0, %v3473_v49, 0  ;;  %v2585_v0 = vpop.f32.mrb[4].mxu1 }
 0x16e   : > { %2590 = vmatpush3.bf16.xpose.msra.mxu1 %v592_v50  ;;  %v543_v1 = vpop.f32.mrb[5].mxu1 }
 0x16f   : > { %v474_v53 = vpop.f32.mrb[8].mxu0  ;;  %v2586_v3 = vpop.f32.mrb[6].mxu1 }
 0x170   : > { %v476_v55 = vpop.f32.mrb[9].mxu0  ;;  %v3495_v5 = vpack.c.bf16 %v2586_v3, %v2585_v0  ;;  %v546_v6 = vpop.f32.mrb[7].mxu1 }
 0x171   : > { %v478_v58 = vpop.f32.mrb[10].mxu0  ;;  %v3497_v8 = vpack.c.bf16 %v546_v6, %v543_v1 }
 0x172   : > { %v3483_v60 = vpack.c.bf16 %v478_v58, %v474_v53  ;;  %v480_v61 = vpop.f32.mrb[11].mxu0 }
 0x173   : > { %v3485_v62 = vpack.c.bf16 %v480_v61, %v476_v55 }
 0x175   : > { %2592 = vmatmul.mubr.msk.bf16.vlgmr.msra.gmra.mrb[8].mxu1 %vm581_vm0, %v3471_v47  ;;  %2741 = vmatprep.subr.msk.bf16.mxu1 %vm581_vm0, %v3485_v62  ;;  %v650_v63 = vsel %vm581_vm0, %v3485_v62, 0 }
 0x176   : > { %2596 = vmatpush3.bf16.xpose.msra.mxu1 %v650_v63  ;;  %2599 = vmatprep.mubr.msk.bf16.mxu1 %vm581_vm0, %v3483_v60 }
 0x177   : > { %v484_v2 = vpop.f32.mrb[12].mxu0 }
 0x178   : > { %v486_v4 = vpop.f32.mrb[13].mxu0 }
 0x179   : > { %v488_v7 = vpop.f32.mrb[14].mxu0 }
 0x17a   : > { %v3499_v9 = vpack.c.bf16 %v488_v7, %v484_v2  ;;  %v490_v10 = vpop.f32.mrb[15].mxu0 }
 0x17b   : > { %v3501_v11 = vpack.c.bf16 %v490_v10, %v486_v4 }
 0x17d   : > { %2742 = vmatprep.subr.msk.bf16.mxu1 %vm581_vm0, %v3501_v11  ;;  %v653_v12 = vsel %vm581_vm0, %v3501_v11, 0 }
 0x17e   : > { %2598 = vmatpush3.bf16.xpose.msra.mxu1 %v653_v12 }
 0x17f   : > { %2603 = vmatprep.subr.bf16.mxu1 %v3481_v59 }
 0x185   : > { %2600 = vmatmul.mubr.msk.bf16.vlgmr.msra.gmra.mrb[12].mxu1 %vm581_vm0, %v3499_v9 }
 0x186   : > { %2604 = vmatpush3.bf16.msra.mxu1 %v3481_v59 }
 0x187   : > { %2605 = vmatprep.subr.bf16.mxu1 %v3479_v56 }
 0x18a   : > { %2606 = vmatpush3.bf16.msra.mxu1 %v3479_v56 }
 0x18b   : > { %2611 = vmatprep.subr.bf16.mxu1 %v3497_v8 }
 0x248   : > { %v2593_v21 = vpop.f32.mrb[8].mxu1 }
 0x249   : > { %v714_v23 = vsel %vm3514_vm1, %v2593_v21, -1e+30  ;;  %v628_v24 = vpop.f32.mrb[9].mxu1 }
 0x24a   : > { %v712_v26 = vsel %vm3518_vm2, %v628_v24, -1e+30  ;;  %v2594_v27 = vpop.f32.mrb[10].mxu1  ;;  %v726_v28 = vsel %vm581_vm0, %v714_v23, -inf }
 0x24b   : > { %v715_v29 = vsel %vm3522_vm3, %v2594_v27, -1e+30  ;;  %727 = vmax.xlane.f32.xlu1 %v726_v28  ;;  %v631_v30 = vpop.f32.mrb[11].mxu1  ;;  %v720_v31 = vsel %vm581_vm0, %v712_v26, -inf }
 0x24c   : > { %v713_v32 = vsel %vm3528_vm4, %v631_v30, -1e+30  ;;  %721 = vmax.xlane.f32.xlu0 %v720_v31  ;;  %v729_v33 = vsel %vm581_vm0, %v715_v29, -inf }
 0x24d   : > { %v723_v34 = vsel %vm581_vm0, %v713_v32, -inf }
 0x24f   : > { %730 = vmax.xlane.f32.xlu1 %v729_v33 }
 0x250   : > { %724 = vmax.xlane.f32.xlu0 %v723_v34 }
 0x258   : > { %v2601_v35 = vpop.f32.mrb[12].mxu1 }
 0x259   : > { %v689_v36 = vpop.f32.mrb[13].mxu1  ;;  %v718_v37 = vsel %vm3514_vm1, %v2601_v35, -1e+30 }
 0x25a   : > { %v716_v38 = vsel %vm3518_vm2, %v689_v36, -1e+30  ;;  %v2602_v39 = vpop.f32.mrb[14].mxu1  ;;  %v738_v48 = vsel %vm581_vm0, %v718_v37, -inf }
 0x25b   : > { %v692_v41 = vpop.f32.mrb[15].mxu1  ;;  %v732_v43 = vsel %vm581_vm0, %v716_v38, -inf  ;;  %v719_v44 = vsel %vm3522_vm3, %v2602_v39, -1e+30 }
 0x25c   : > { %v717_v45 = vsel %vm3528_vm4, %v692_v41, -1e+30  ;;  %733 = vmax.xlane.f32.xlu0 %v732_v43  ;;  %v741_v50 = vsel %vm581_vm0, %v719_v44, -inf }
 0x25d   : > { %v735_v46 = vsel %vm581_vm0, %v717_v45, -inf }
 0x25e   : > { %736 = vmax.xlane.f32.xlu1 %v735_v46 }
 0x260   : > { %739 = vmax.xlane.f32.xlu0 %v738_v48 }
 0x262   : > { %742 = vmax.xlane.f32.xlu1 %v741_v50 }
 0x2d8   : > { %v728_v51 = vpop.xlane.xlu1 %727 }
 0x2d9   : > { %v746_v52 = vsub.f32 %v714_v23, %v728_v51  ;;  %v722_v53 = vpop.xlane.xlu0 %721 }
 0x2da   : > { %v744_v54 = vsub.f32 %v712_v26, %v722_v53 }
 0x2db   : > { %v756_v55 = vmul.f32 1.442695, %v746_v52 }
 0x2dc   : > { %v752_v57 = vmul.f32 1.442695, %v744_v54  ;;  %v731_v58 = vpop.xlane.xlu1 %730 }
 0x2dd   : > { %2934 = vpow2.f32 %v756_v55  ;;  %v747_v61 = vsub.f32 %v715_v29, %v731_v58  ;;  %v725_v63 = vpop.xlane.xlu0 %724 }
 0x2de   : > { %v745_v0 = vsub.f32 %v713_v32, %v725_v63  ;;  %2936 = vpow2.f32 %v752_v57 }
 0x2df   : > { %v758_v1 = vmul.f32 1.442695, %v747_v61 }
 0x2e0   : > { %v754_v2 = vmul.f32 1.442695, %v745_v0 }
 0x2e1   : > { %2938 = vpow2.f32 %v758_v1 }
 0x2e2   : > { %2940 = vpow2.f32 %v754_v2 }
 0x2e7   : > { %v3554_v3 = vpop.eup %2934 }
 0x2e8   : > { %v774_v4 = vsel %vm581_vm0, %v3554_v3, 0.0  ;;  %v2937_v6 = vpop.eup %2936 }
 0x2e9   : > { %775 = vadd.xlane.f32.xlu0 %v774_v4  ;;  %v734_v7 = vpop.xlane.xlu0 %733  ;;  %v768_v13 = vsel %vm581_vm0, %v2937_v6, 0.0 }
 0x2ea   : > { %v748_v12 = vsub.f32 %v716_v38, %v734_v7 }
 0x2eb   : > { %v2939_v10 = vpop.eup %2938  ;;  %v737_v29 = vpop.xlane.xlu1 %736 }
 0x2ec   : > { %v777_v14 = vsel %vm581_vm0, %v2939_v10, 0.0  ;;  %v2941_v15 = vpop.eup %2940  ;;  %v760_v18 = vmul.f32 1.442695, %v748_v12  ;;  %v749_v32 = vsub.f32 %v717_v45, %v737_v29 }
 0x2ed   : > { %769 = vadd.xlane.f32.xlu0 %v768_v13  ;;  %v740_v16 = vpop.xlane.xlu0 %739  ;;  %778 = vadd.xlane.f32.xlu1 %v777_v14  ;;  %v771_v23 = vsel %vm581_vm0, %v2941_v15, 0.0 }
 0x2ee   : > { %v750_v17 = vsub.f32 %v718_v37, %v740_v16  ;;  %v762_v34 = vmul.f32 1.442695, %v749_v32 }
 0x2ef   : > { %v743_v30 = vpop.xlane.xlu1 %742 }
 0x2f0   : > { %v764_v21 = vmul.f32 1.442695, %v750_v17  ;;  %v751_v31 = vsub.f32 %v719_v44, %v743_v30 }
 0x2f1   : > { %772 = vadd.xlane.f32.xlu1 %v771_v23 }
 0x2f2   : > { %2942 = vpow2.f32 %v764_v21  ;;  %v766_v33 = vmul.f32 1.442695, %v751_v31 }
 0x2f3   : > { %2944 = vpow2.f32 %v760_v18 }
 0x2f4   : > { %2946 = vpow2.f32 %v766_v33 }
 0x2f5   : > { %2948 = vpow2.f32 %v762_v34 }
 0x2fc   : > { %v3561_v24 = vpop.eup %2942 }
 0x2fd   : > { %v786_v26 = vsel %vm581_vm0, %v3561_v24, 0.0  ;;  %v3565_v27 = vpop.eup %2944 }
 0x2fe   : > { %787 = vadd.xlane.f32.xlu0 %v786_v26  ;;  %v780_v28 = vsel %vm581_vm0, %v3565_v27, 0.0  ;;  %v2947_v35 = vpop.eup %2946 }
 0x2ff   : > { %v789_v36 = vsel %vm581_vm0, %v2947_v35, 0.0  ;;  %v2949_v37 = vpop.eup %2948 }
 0x300   : > { %v783_v38 = vsel %vm581_vm0, %v2949_v37, 0.0 }
 0x302   : > { %781 = vadd.xlane.f32.xlu0 %v780_v28  ;;  %932 = vrot.lane.b32.xlu1 %v3473_v49, %s3230_s21 }
 0x306   : > { %1003 = vrot.lane.b32.xlu1 %v3485_v62, %s3230_s21 }
 0x318   : > { %930 = vrot.lane.b32.xlu0 %v3463_v42, %s3230_s21 }
 0x31c   : > { %926 = vrot.lane.b32.xlu0 %v3471_v47, %s3230_s21 }
 0x320   : > { %997 = vrot.lane.b32.xlu0 %v3483_v60, %s3230_s21 }
 0x32a   : > { %790 = vadd.xlane.f32.xlu1 %v789_v36 }
 0x32e   : > { %784 = vadd.xlane.f32.xlu1 %v783_v38 }
 0x33f   : > { %924 = vrot.lane.b32.xlu1 %v3461_v40, %s3230_s21 }
 0x343   : > { %1005 = vrot.lane.b32.xlu1 %v3501_v11, %s3230_s21 }
 0x347   : > { %999 = vrot.lane.b32.xlu1 %v3499_v9, %s3230_s21 }
 0x376   : > { %v776_v39 = vpop.xlane.xlu0 %775 }
 0x37a   : > { %v770_v41 = vpop.xlane.xlu0 %769  ;;  %v779_v43 = vpop.xlane.xlu1 %778 }
 0x37b   : > { %2950 = vrcp.f32 %v779_v43 }
 0x37c   : > { %2952 = vrcp.f32 %v770_v41 }
 0x37d   : > { %2954 = vrcp.f32 %v776_v39 }
 0x37e   : > { %v773_v44 = vpop.xlane.xlu1 %772 }
 0x37f   : > { %2956 = vrcp.f32 %v773_v44 }
 0x382   : > { %v933_v61 = vpop.permute.xlu1 %932 }
 0x385   : > { %v2951_v45 = vpop.eup %2950 }
 0x386   : > { %v2953_v46 = vpop.eup %2952  ;;  %v803_v51 = vmul.f32 %v2951_v45, %v2939_v10  ;;  %v1004_v1 = vpop.permute.xlu1 %1003 }
 0x387   : > { %v2955_v48 = vpop.eup %2954  ;;  %v800_v52 = vmul.f32 %v2953_v46, %v2937_v6  ;;  %v1014_v29 = vsel %vm581_vm0, %v1004_v1, 0 }
 0x388   : > { %v802_v54 = vmul.f32 %v2955_v48, %v3554_v3  ;;  %v944_v3 = vsel %vm581_vm0, %v933_v61, 0 }
 0x389   : > { %v2957_v50 = vpop.eup %2956 }
 0x38a   : > { %v801_v53 = vmul.f32 %v2957_v50, %v2941_v15  ;;  %v809_v58 = vpack.c.bf16 %v803_v51, %v802_v54 }
 0x38b   : > { %v788_v55 = vpop.xlane.xlu0 %787 }
 0x38c   : > { %v808_v57 = vpack.c.bf16 %v801_v53, %v800_v52 }
 0x38e   : > { %2607 = vmatprep.mubr.msk.bf16.mxu1 %vm581_vm0, %v808_v57 }
 0x38f   : > { %v782_v63 = vpop.xlane.xlu0 %781  ;;  %2608 = vmatmul.mubr.msk.bf16.vlgmr.msra.gmra.mrb[16].mxu1 %vm581_vm0, %v809_v58 }
 0x390   : > { %2612 = vmatpush3.bf16.msra.mxu1 %v3497_v8 }
 0x391   : > { %2613 = vmatprep.subr.bf16.mxu1 %v3495_v5 }
 0x393   : > { %v931_v0 = vpop.permute.xlu0 %930 }
 0x394   : > { %v941_v2 = vsel %vm581_vm0, %v931_v0, 0  ;;  %2614 = vmatpush3.bf16.msra.mxu1 %v3495_v5  ;;  %2743 = vmatprep.subr.msk.bf16.mxu0 %vm581_vm0, %v931_v0 }
 0x395   : > { %2745 = vmatprep.subr.msk.bf16.mxu1 %vm581_vm0, %v1004_v1  ;;  %2620 = vmatpush3.bf16.xpose.msra.mxu0 %v941_v2 }
 0x396   : > { %2744 = vmatprep.subr.msk.bf16.mxu0 %vm581_vm0, %v933_v61 }
 0x397   : > { %v927_v10 = vpop.permute.xlu0 %926 }
 0x39b   : > { %v998_v28 = vpop.permute.xlu0 %997 }
 0x39d   : > { %2622 = vmatpush3.bf16.xpose.msra.mxu0 %v944_v3 }
 0x3b7   : > { %v791_v4 = vpop.xlane.xlu1 %790 }
 0x3b8   : > { %2958 = vrcp.f32 %v791_v4 }
 0x3b9   : > { %2960 = vrcp.f32 %v782_v63 }
 0x3ba   : > { %2962 = vrcp.f32 %v788_v55 }
 0x3bb   : > { %v785_v6 = vpop.xlane.xlu1 %784 }
 0x3bc   : > { %2964 = vrcp.f32 %v785_v6 }
 0x3bf   : > { %v925_v7 = vpop.permute.xlu1 %924 }
 0x3c0   : > { %2623 = vmatprep.mubr.msk.bf16.mxu0 %vm581_vm0, %v925_v7 }
 0x3c1   : > { %2624 = vmatmul.mubr.msk.bf16.vlgmr.msra.gmra.mrb[16].mxu0 %vm581_vm0, %v927_v10 }
 0x3c2   : > { %v2959_v12 = vpop.eup %2958 }
 0x3c3   : > { %v2961_v13 = vpop.eup %2960  ;;  %v807_v16 = vmul.f32 %v2959_v12, %v2947_v35  ;;  %v1006_v30 = vpop.permute.xlu1 %1005 }
 0x3c4   : > { %v2963_v14 = vpop.eup %2962  ;;  %v804_v17 = vmul.f32 %v2961_v13, %v3565_v27  ;;  %v1017_v27 = vsel %vm581_vm0, %v1006_v30, 0 }
 0x3c5   : > { %v806_v21 = vmul.f32 %v2963_v14, %v3561_v24 }
 0x3c6   : > { %v2965_v15 = vpop.eup %2964 }
 0x3c7   : > { %v805_v18 = vmul.f32 %v2965_v15, %v2949_v37  ;;  %v811_v26 = vpack.c.bf16 %v807_v16, %v806_v21  ;;  %v1000_v31 = vpop.permute.xlu1 %999 }
 0x3c9   : > { %v810_v23 = vpack.c.bf16 %v805_v18, %v804_v17 }
 0x3cb   : > { %2615 = vmatprep.mubr.msk.bf16.mxu1 %vm581_vm0, %v810_v23 }
 0x3cc   : > { %2616 = vmatmul.mubr.msk.bf16.vlgmr.msra.gmra.mrb[20].mxu1 %vm581_vm0, %v811_v26 }
 0x3cd   : > { %2628 = vmatpush3.bf16.xpose.msra.mxu1 %v1014_v29  ;;  %2631 = vmatprep.mubr.msk.bf16.mxu1 %vm581_vm0, %v998_v28 }
 0x3ce   : > { %2746 = vmatprep.subr.msk.bf16.mxu1 %vm581_vm0, %v1006_v30 }
 0x3d5   : > { %2630 = vmatpush3.bf16.xpose.msra.mxu1 %v1017_v27 }
 0x3dc   : > { %2632 = vmatmul.mubr.msk.bf16.vlgmr.msra.gmra.mrb[24].mxu1 %vm581_vm0, %v1000_v31 }
 0x462   : > { %v3609_v24 = vpop.f32.mrb[16].mxu1 }
 0x463   : > { %v3611_v32 = vpop.f32.mrb[17].mxu1 }
 0x464   : > { %v3613_v33 = vpop.f32.mrb[18].mxu1 }
 0x465   : > { %v3615_v34 = vpop.f32.mrb[19].mxu1 }
 0x494   : > { %v2625_v35 = vpop.f32.mrb[16].mxu0 }
 0x495   : > { %v980_v36 = vpop.f32.mrb[17].mxu0  ;;  %v1070_v43 = vsel %vm3514_vm1, %v2625_v35, -1e+30 }
 0x496   : > { %v1068_v37 = vsel %vm3518_vm2, %v980_v36, -1e+30  ;;  %v2626_v38 = vpop.f32.mrb[18].mxu0  ;;  %v1082_v46 = vsel %vm581_vm0, %v1070_v43, -inf }
 0x497   : > { %v983_v39 = vpop.f32.mrb[19].mxu0  ;;  %v1076_v41 = vsel %vm581_vm0, %v1068_v37, -inf  ;;  %v1071_v48 = vsel %vm3522_vm3, %v2626_v38, -1e+30 }
 0x498   : > { %v1069_v44 = vsel %vm3528_vm4, %v983_v39, -1e+30  ;;  %1077 = vmax.xlane.f32.xlu0 %v1076_v41  ;;  %v1085_v51 = vsel %vm581_vm0, %v1071_v48, -inf }
 0x499   : > { %v1079_v45 = vsel %vm581_vm0, %v1069_v44, -inf }
 0x49a   : > { %1080 = vmax.xlane.f32.xlu1 %v1079_v45 }
 0x49c   : > { %1083 = vmax.xlane.f32.xlu0 %v1082_v46 }
 0x49f   : > { %v3628_v50 = vpop.f32.mrb[20].mxu1 }
 0x4a0   : > { %v3631_v52 = vpop.f32.mrb[21].mxu1  ;;  %1086 = vmax.xlane.f32.xlu0 %v1085_v51 }
 0x4a1   : > { %v3633_v53 = vpop.f32.mrb[22].mxu1 }
 0x4a2   : > { %v3635_v54 = vpop.f32.mrb[23].mxu1 }
 0x4af   : > { %v2633_v55 = vpop.f32.mrb[24].mxu1 }
 0x4b0   : > { %v1053_v57 = vpop.f32.mrb[25].mxu1  ;;  %v1074_v1 = vsel %vm3514_vm1, %v2633_v55, -1e+30 }
 0x4b1   : > { %v1072_v58 = vsel %vm3518_vm2, %v1053_v57, -1e+30  ;;  %v2634_v61 = vpop.f32.mrb[26].mxu1  ;;  %v1094_v6 = vsel %vm581_vm0, %v1074_v1, -inf }
 0x4b2   : > { %v1056_v63 = vpop.f32.mrb[27].mxu1  ;;  %v1088_v0 = vsel %vm581_vm0, %v1072_v58, -inf  ;;  %v1075_v4 = vsel %vm3522_vm3, %v2634_v61, -1e+30 }
 0x4b3   : > { %v1073_v2 = vsel %vm3528_vm4, %v1056_v63, -1e+30  ;;  %1089 = vmax.xlane.f32.xlu0 %v1088_v0  ;;  %v1097_v7 = vsel %vm581_vm0, %v1075_v4, -inf }
 0x4b4   : > { %v1091_v3 = vsel %vm581_vm0, %v1073_v2, -inf }
 0x4b5   : > { %1092 = vmax.xlane.f32.xlu1 %v1091_v3 }
 0x4b7   : > { %1095 = vmax.xlane.f32.xlu0 %v1094_v6 }
 0x4b9   : > { %1098 = vmax.xlane.f32.xlu1 %v1097_v7 }
 0x525   : > { %v1078_v10 = vpop.xlane.xlu0 %1077 }
 0x526   : > { %v1100_v12 = vsub.f32 %v1068_v37, %v1078_v10 }
 0x527   : > { %v1081_v13 = vpop.xlane.xlu1 %1080 }
 0x528   : > { %v1108_v14 = vmul.f32 1.442695, %v1100_v12  ;;  %v1101_v15 = vsub.f32 %v1069_v44, %v1081_v13 }
 0x529   : > { %v1084_v16 = vpop.xlane.xlu0 %1083 }
 0x52a   : > { %2966 = vpow2.f32 %v1108_v14  ;;  %v1110_v17 = vmul.f32 1.442695, %v1101_v15  ;;  %v1102_v18 = vsub.f32 %v1070_v43, %v1084_v16 }
 0x52c   : > { %2968 = vpow2.f32 %v1110_v17  ;;  %v1112_v21 = vmul.f32 1.442695, %v1102_v18 }
 0x52d   : > { %v1087_v23 = vpop.xlane.xlu0 %1086 }
 0x52e   : > { %2970 = vpow2.f32 %v1112_v21  ;;  %v1103_v26 = vsub.f32 %v1071_v48, %v1087_v23 }
 0x530   : > { %v1114_v28 = vmul.f32 1.442695, %v1103_v26 }
 0x532   : > { %2972 = vpow2.f32 %v1114_v28 }
 0x534   : > { %v3649_v29 = vpop.eup %2966 }
 0x535   : > { %v1124_v30 = vsel %vm581_vm0, %v3649_v29, 0.0 }
 0x536   : > { %v3653_v27 = vpop.eup %2968  ;;  %1125 = vadd.xlane.f32.xlu0 %v1124_v30 }
 0x537   : > { %v1127_v31 = vsel %vm581_vm0, %v3653_v27, 0.0 }
 0x538   : > { %v3657_v35 = vpop.eup %2970  ;;  %1128 = vadd.xlane.f32.xlu1 %v1127_v31 }
 0x539   : > { %v1130_v36 = vsel %vm581_vm0, %v3657_v35, 0.0 }
 0x53a   : > { %1131 = vadd.xlane.f32.xlu0 %v1130_v36 }
 0x53c   : > { %v3661_v37 = vpop.eup %2972 }
 0x53d   : > { %v1133_v38 = vsel %vm581_vm0, %v3661_v37, 0.0 }
 0x53e   : > { %1134 = vadd.xlane.f32.xlu1 %v1133_v38 }
 0x540   : > { %v1090_v39 = vpop.xlane.xlu0 %1089 }
 0x541   : > { %v1104_v45 = vsub.f32 %v1072_v58, %v1090_v39 }
 0x542   : > { %v1093_v44 = vpop.xlane.xlu1 %1092 }
 0x543   : > { %v1116_v48 = vmul.f32 1.442695, %v1104_v45  ;;  %v1105_v57 = vsub.f32 %v1073_v2, %v1093_v44 }
 0x544   : > { %v1096_v41 = vpop.xlane.xlu0 %1095 }
 0x545   : > { %v1106_v43 = vsub.f32 %v1074_v1, %v1096_v41  ;;  %v1118_v0 = vmul.f32 1.442695, %v1105_v57 }
 0x546   : > { %v1099_v51 = vpop.xlane.xlu1 %1098 }
 0x547   : > { %v1120_v46 = vmul.f32 1.442695, %v1106_v43  ;;  %v1107_v55 = vsub.f32 %v1075_v4, %v1099_v51 }
 0x549   : > { %2974 = vpow2.f32 %v1120_v46  ;;  %v1122_v61 = vmul.f32 1.442695, %v1107_v55 }
 0x54a   : > { %2976 = vpow2.f32 %v1116_v48 }
 0x54b   : > { %2978 = vpow2.f32 %v1122_v61 }
 0x54c   : > { %2980 = vpow2.f32 %v1118_v0 }
 0x54f   : > { %1172 = vrot.lane.b32.xlu1 %v3479_v56, %s3230_s21 }
 0x550   : > { %1170 = vrot.lane.b32.xlu0 %v3481_v59, %s3230_s21 }
 0x553   : > { %1233 = vrot.lane.b32.xlu1 %v3497_v8, %s3230_s21  ;;  %v3677_v63 = vpop.eup %2974 }
 0x554   : > { %1298 = vrot.lane.b32.xlu0 %v3463_v42, %s3231_s23  ;;  %v1142_v3 = vsel %vm581_vm0, %v3677_v63, 0.0  ;;  %v3681_v6 = vpop.eup %2976 }
 0x555   : > { %v1136_v58 = vsel %vm581_vm0, %v3681_v6, 0.0  ;;  %v3685_v1 = vpop.eup %2978 }
 0x556   : > { %v1145_v2 = vsel %vm581_vm0, %v3685_v1, 0.0  ;;  %v3689_v4 = vpop.eup %2980 }
 0x557   : > { %1235 = vrot.lane.b32.xlu1 %v3495_v5, %s3230_s21  ;;  %v1139_v7 = vsel %vm581_vm0, %v3689_v4, 0.0 }
 0x55b   : > { %1300 = vrot.lane.b32.xlu1 %v3473_v49, %s3231_s23 }
 0x573   : > { %1143 = vadd.xlane.f32.xlu0 %v1142_v3 }
 0x577   : > { %1137 = vadd.xlane.f32.xlu0 %v1136_v58 }
 0x57f   : > { %1146 = vadd.xlane.f32.xlu1 %v1145_v2 }
 0x583   : > { %1140 = vadd.xlane.f32.xlu1 %v1139_v7 }
 0x58d   : > { %1367 = vrot.lane.b32.xlu0 %v3485_v62, %s3231_s23 }
 0x591   : > { %1296 = vrot.lane.b32.xlu0 %v3471_v47, %s3231_s23 }
 0x594   : > { %1294 = vrot.lane.b32.xlu1 %v3461_v40, %s3231_s23 }
 0x595   : > { %1363 = vrot.lane.b32.xlu0 %v3483_v60, %s3231_s23 }
 0x598   : > { %1369 = vrot.lane.b32.xlu1 %v3501_v11, %s3231_s23 }
 0x59c   : > { %1365 = vrot.lane.b32.xlu1 %v3499_v9, %s3231_s23 }
 0x5c3   : > { %v1126_v10 = vpop.xlane.xlu0 %1125 }
 0x5c4   : > { %2982 = vrcp.f32 %v1126_v10 }
 0x5c5   : > { %v1129_v12 = vpop.xlane.xlu1 %1128 }
 0x5c6   : > { %2984 = vrcp.f32 %v1129_v12 }
 0x5c7   : > { %v1132_v13 = vpop.xlane.xlu0 %1131 }
 0x5c8   : > { %2986 = vrcp.f32 %v1132_v13 }
 0x5cb   : > { %v1171_v14 = vpop.permute.xlu0 %1170  ;;  %v1135_v15 = vpop.xlane.xlu1 %1134 }
 0x5cc   : > { %2988 = vrcp.f32 %v1135_v15  ;;  %2635 = vmatprep.subr.bf16.mxu0 %v1171_v14 }
 0x5cd   : > { %2636 = vmatpush3.bf16.msra.mxu0 %v1171_v14 }
 0x5ce   : > { %v2983_v16 = vpop.eup %2982 }
 0x5cf   : > { %v1173_v17 = vpop.permute.xlu1 %1172  ;;  %v1299_v21 = vpop.permute.xlu0 %1298  ;;  %v1156_v23 = vmul.f32 %v2983_v16, %v3649_v29 }
 0x5d0   : > { %v2985_v18 = vpop.eup %2984  ;;  %2637 = vmatprep.subr.bf16.mxu0 %v1173_v17 }
 0x5d1   : > { %2638 = vmatpush3.bf16.msra.mxu0 %v1173_v17  ;;  %v1157_v26 = vmul.f32 %v2985_v18, %v3653_v27  ;;  %v1309_v27 = vsel %vm581_vm0, %v1299_v21, 0 }
 0x5d2   : > { %2747 = vmatprep.subr.msk.bf16.mxu0 %vm581_vm0, %v1299_v21  ;;  %v2987_v31 = vpop.eup %2986 }
 0x5d3   : > { %v1234_v28 = vpop.permute.xlu1 %1233  ;;  %v1164_v30 = vpack.c.bf16 %v1157_v26, %v1156_v23  ;;  %v1158_v38 = vmul.f32 %v2987_v31, %v3657_v35 }
 0x5d4   : > { %2643 = vmatprep.subr.bf16.mxu1 %v1234_v28 }
 0x5d5   : > { %2639 = vmatprep.mubr.msk.bf16.mxu0 %vm581_vm0, %v1164_v30  ;;  %2644 = vmatpush3.bf16.msra.mxu1 %v1234_v28 }
 0x5d6   : > { %v2989_v36 = vpop.eup %2988 }
 0x5d7   : > { %v1159_v39 = vmul.f32 %v2989_v36, %v3661_v37  ;;  %v1236_v41 = vpop.permute.xlu1 %1235 }
 0x5d8   : > { %2645 = vmatprep.subr.bf16.mxu1 %v1236_v41 }
 0x5d9   : > { %2646 = vmatpush3.bf16.msra.mxu1 %v1236_v41  ;;  %v1165_v29 = vpack.c.bf16 %v1159_v39, %v1158_v38 }
 0x5db   : > { %2640 = vmatmul.mubr.msk.bf16.vlgmr.msra.gmra.mrb[20].mxu0 %vm581_vm0, %v1165_v29  ;;  %v1301_v43 = vpop.permute.xlu1 %1300 }
 0x5dc   : > { %2652 = vmatpush3.bf16.xpose.msra.mxu0 %v1309_v27  ;;  %v1312_v44 = vsel %vm581_vm0, %v1301_v43, 0 }
 0x5dd   : > { %2748 = vmatprep.subr.msk.bf16.mxu0 %vm581_vm0, %v1301_v43 }
 0x5e4   : > { %2654 = vmatpush3.bf16.xpose.msra.mxu0 %v1312_v44 }
 0x600   : > { %v1144_v45 = vpop.xlane.xlu0 %1143 }
 0x604   : > { %v1138_v46 = vpop.xlane.xlu0 %1137 }
 0x608   : > { %v1368_v35 = vpop.permute.xlu0 %1367 }
 0x609   : > { %2749 = vmatprep.subr.msk.bf16.mxu1 %vm581_vm0, %v1368_v35  ;;  %v1378_v14 = vsel %vm581_vm0, %v1368_v35, 0 }
 0x60c   : > { %v1147_v37 = vpop.xlane.xlu1 %1146  ;;  %v1297_v55 = vpop.permute.xlu0 %1296 }
 0x60d   : > { %2990 = vrcp.f32 %v1147_v37 }
 0x60e   : > { %2992 = vrcp.f32 %v1138_v46 }
 0x60f   : > { %2994 = vrcp.f32 %v1144_v45 }
 0x610   : > { %v1141_v48 = vpop.xlane.xlu1 %1140  ;;  %v1364_v15 = vpop.permute.xlu0 %1363 }
 0x611   : > { %2996 = vrcp.f32 %v1141_v48 }
 0x614   : > { %v1295_v51 = vpop.permute.xlu1 %1294 }
 0x615   : > { %2655 = vmatprep.mubr.msk.bf16.mxu0 %vm581_vm0, %v1295_v51 }
 0x616   : > { %2656 = vmatmul.mubr.msk.bf16.vlgmr.msra.gmra.mrb[24].mxu0 %vm581_vm0, %v1297_v55 }
 0x617   : > { %v2991_v57 = vpop.eup %2990 }
 0x618   : > { %v2993_v61 = vpop.eup %2992  ;;  %v1163_v58 = vmul.f32 %v2991_v57, %v3685_v1  ;;  %v1370_v16 = vpop.permute.xlu1 %1369 }
 0x619   : > { %v2995_v0 = vpop.eup %2994  ;;  %v1160_v2 = vmul.f32 %v2993_v61, %v3681_v6  ;;  %v1381_v6 = vsel %vm581_vm0, %v1370_v16, 0 }
 0x61a   : > { %v1162_v10 = vmul.f32 %v2995_v0, %v3677_v63 }
 0x61b   : > { %v2997_v3 = vpop.eup %2996 }
 0x61c   : > { %v1161_v7 = vmul.f32 %v2997_v3, %v3689_v4  ;;  %v1167_v13 = vpack.c.bf16 %v1163_v58, %v1162_v10  ;;  %v1366_v1 = vpop.permute.xlu1 %1365 }
 0x61e   : > { %v1166_v12 = vpack.c.bf16 %v1161_v7, %v1160_v2 }
 0x620   : > { %2647 = vmatprep.mubr.msk.bf16.mxu1 %vm581_vm0, %v1166_v12 }
 0x621   : > { %2648 = vmatmul.mubr.msk.bf16.vlgmr.msra.gmra.mrb[28].mxu1 %vm581_vm0, %v1167_v13 }
 0x622   : > { %2660 = vmatpush3.bf16.xpose.msra.mxu1 %v1378_v14  ;;  %2663 = vmatprep.mubr.msk.bf16.mxu1 %vm581_vm0, %v1364_v15 }
 0x623   : > { %2750 = vmatprep.subr.msk.bf16.mxu1 %vm581_vm0, %v1370_v16 }
 0x62a   : > { %2662 = vmatpush3.bf16.xpose.msra.mxu1 %v1381_v6 }
 0x631   : > { %2664 = vmatmul.mubr.msk.bf16.vlgmr.msra.gmra.mrb[32].mxu1 %vm581_vm0, %v1366_v1 }
 0x6ae   : > { %v3729_v63 = vpop.f32.mrb[20].mxu0 }
 0x6af   : > { %v3731_v4 = vpop.f32.mrb[21].mxu0 }
 0x6b0   : > { %v3733_v17 = vpop.f32.mrb[22].mxu0 }
 0x6b1   : > { %v2839_v18 = vpack.i.bf16 %v3733_v17, %v3729_v63  ;;  %v3737_v21 = vpop.f32.mrb[23].mxu0 }
 0x6b2   : > { %v2834_v23 = vpack.i.bf16 %v3737_v21, %v3731_v4 }
 0x6e9   : > { %v2657_v26 = vpop.f32.mrb[24].mxu0 }
 0x6ea   : > { %v1348_v28 = vpop.f32.mrb[25].mxu0  ;;  %v1434_v39 = vsel %vm3514_vm1, %v2657_v26, -1e+30 }
 0x6eb   : > { %v1432_v30 = vsel %vm3518_vm2, %v1348_v28, -1e+30  ;;  %v2658_v31 = vpop.f32.mrb[26].mxu0  ;;  %v1446_v27 = vsel %vm581_vm0, %v1434_v39, -inf }
 0x6ec   : > { %v1351_v36 = vpop.f32.mrb[27].mxu0  ;;  %v1440_v38 = vsel %vm581_vm0, %v1432_v30, -inf  ;;  %v1435_v43 = vsel %vm3522_vm3, %v2658_v31, -1e+30 }
 0x6ed   : > { %v1433_v41 = vsel %vm3528_vm4, %v1351_v36, -1e+30  ;;  %1441 = vmax.xlane.f32.xlu0 %v1440_v38  ;;  %v1449_v45 = vsel %vm581_vm0, %v1435_v43, -inf }
 0x6ee   : > { %v1443_v29 = vsel %vm581_vm0, %v1433_v41, -inf }
 0x6ef   : > { %1444 = vmax.xlane.f32.xlu1 %v1443_v29 }
 0x6f1   : > { %1447 = vmax.xlane.f32.xlu0 %v1446_v27 }
 0x6f4   : > { %v3752_v44 = vpop.f32.mrb[28].mxu1 }
 0x6f5   : > { %v3755_v46 = vpop.f32.mrb[29].mxu1  ;;  %1450 = vmax.xlane.f32.xlu0 %v1449_v45 }
 0x6f6   : > { %v3757_v35 = vpop.f32.mrb[30].mxu1 }
 0x6f7   : > { %v2869_v37 = vpack.i.bf16 %v3757_v35, %v3752_v44  ;;  %v3761_v48 = vpop.f32.mrb[31].mxu1 }
 0x6f8   : > { %v2864_v51 = vpack.i.bf16 %v3761_v48, %v3755_v46 }
 0x704   : > { %v2665_v55 = vpop.f32.mrb[32].mxu1 }
 0x705   : > { %v1417_v57 = vpop.f32.mrb[33].mxu1  ;;  %v1438_v2 = vsel %vm3514_vm1, %v2665_v55, -1e+30 }
 0x706   : > { %v1436_v61 = vsel %vm3518_vm2, %v1417_v57, -1e+30  ;;  %v2666_v0 = vpop.f32.mrb[34].mxu1  ;;  %v1458_v13 = vsel %vm581_vm0, %v1438_v2, -inf }
 0x707   : > { %v1420_v3 = vpop.f32.mrb[35].mxu1  ;;  %v1452_v58 = vsel %vm581_vm0, %v1436_v61, -inf  ;;  %v1439_v12 = vsel %vm3522_vm3, %v2666_v0, -1e+30 }
 0x708   : > { %v1437_v7 = vsel %vm3528_vm4, %v1420_v3, -1e+30  ;;  %1453 = vmax.xlane.f32.xlu0 %v1452_v58  ;;  %v1461_v14 = vsel %vm581_vm0, %v1439_v12, -inf }
 0x709   : > { %v1455_v10 = vsel %vm581_vm0, %v1437_v7, -inf }
 0x70a   : > { %1456 = vmax.xlane.f32.xlu1 %v1455_v10 }
 0x70c   : > { %1459 = vmax.xlane.f32.xlu0 %v1458_v13 }
 0x70e   : > { %1462 = vmax.xlane.f32.xlu1 %v1461_v14 }
 0x77a   : > { %v1442_v15 = vpop.xlane.xlu0 %1441 }
 0x77b   : > { %v1464_v16 = vsub.f32 %v1432_v30, %v1442_v15 }
 0x77c   : > { %v1445_v6 = vpop.xlane.xlu1 %1444 }
 0x77d   : > { %v1472_v1 = vmul.f32 1.442695, %v1464_v16  ;;  %v1465_v26 = vsub.f32 %v1433_v41, %v1445_v6 }
 0x77e   : > { %v1448_v28 = vpop.xlane.xlu0 %1447 }
 0x77f   : > { %2998 = vpow2.f32 %v1472_v1  ;;  %v1474_v31 = vmul.f32 1.442695, %v1465_v26  ;;  %v1466_v36 = vsub.f32 %v1434_v39, %v1448_v28 }
 0x781   : > { %3000 = vpow2.f32 %v1474_v31  ;;  %v1476_v38 = vmul.f32 1.442695, %v1466_v36 }
 0x782   : > { %v1451_v29 = vpop.xlane.xlu0 %1450 }
 0x783   : > { %3002 = vpow2.f32 %v1476_v38  ;;  %v1467_v27 = vsub.f32 %v1435_v43, %v1451_v29 }
 0x785   : > { %v1478_v45 = vmul.f32 1.442695, %v1467_v27 }
 0x787   : > { %3004 = vpow2.f32 %v1478_v45 }
 0x789   : > { %v3777_v55 = vpop.eup %2998 }
 0x78a   : > { %v1488_v57 = vsel %vm581_vm0, %v3777_v55, 0.0 }
 0x78b   : > { %v3781_v30 = vpop.eup %3000  ;;  %1489 = vadd.xlane.f32.xlu0 %v1488_v57 }
 0x78c   : > { %v1491_v41 = vsel %vm581_vm0, %v3781_v30, 0.0 }
 0x78d   : > { %v3785_v0 = vpop.eup %3002  ;;  %1492 = vadd.xlane.f32.xlu1 %v1491_v41 }
 0x78e   : > { %v1494_v39 = vsel %vm581_vm0, %v3785_v0, 0.0 }
 0x78f   : > { %1495 = vadd.xlane.f32.xlu0 %v1494_v39 }
 0x791   : > { %v3789_v43 = vpop.eup %3004 }
 0x792   : > { %v1497_v3 = vsel %vm581_vm0, %v3789_v43, 0.0 }
 0x793   : > { %1498 = vadd.xlane.f32.xlu1 %v1497_v3 }
 0x795   : > { %v1454_v58 = vpop.xlane.xlu0 %1453 }
 0x796   : > { %v1468_v15 = vsub.f32 %v1436_v61, %v1454_v58 }
 0x797   : > { %v1457_v14 = vpop.xlane.xlu1 %1456 }
 0x798   : > { %v1480_v6 = vmul.f32 1.442695, %v1468_v15  ;;  %v1469_v28 = vsub.f32 %v1437_v7, %v1457_v14 }
 0x799   : > { %v1460_v10 = vpop.xlane.xlu0 %1459 }
 0x79a   : > { %v1470_v13 = vsub.f32 %v1438_v2, %v1460_v10 }
 0x79b   : > { %v1463_v1 = vpop.xlane.xlu1 %1462 }
 0x79c   : > { %v1484_v16 = vmul.f32 1.442695, %v1470_v13  ;;  %v1471_v26 = vsub.f32 %v1439_v12, %v1463_v1 }
 0x79e   : > { %3006 = vpow2.f32 %v1484_v16  ;;  %v1486_v31 = vmul.f32 1.442695, %v1471_v26 }
 0x79f   : > { %3008 = vpow2.f32 %v1480_v6 }
 0x7a0   : > { %3010 = vpow2.f32 %v1486_v31 }
 0x7a4   : > { %1534 = vrot.lane.b32.xlu1 %v3479_v56, %s3231_s23 }
 0x7a5   : > { %1532 = vrot.lane.b32.xlu0 %v3481_v59, %s3231_s23 }
 0x7a8   : > { %1593 = vrot.lane.b32.xlu1 %v3497_v8, %s3231_s23  ;;  %v3805_v36 = vpop.eup %3006 }
 0x7a9   : > { %1658 = vrot.lane.b32.xlu0 %v3463_v42, %s3232_s30  ;;  %v1482_v42 = vmul.f32 1.442695, %v1469_v28  ;;  %v1506_v38 = vsel %vm581_vm0, %v3805_v36, 0.0  ;;  %v3809_v29 = vpop.eup %3008 }
 0x7aa   : > { %v3813_v61 = vpop.eup %3010 }
 0x7ab   : > { %3012 = vpow2.f32 %v1482_v42  ;;  %v1509_v2 = vsel %vm581_vm0, %v3813_v61, 0.0 }
 0x7ac   : > { %1595 = vrot.lane.b32.xlu1 %v3495_v5, %s3231_s23 }
 0x7b0   : > { %1660 = vrot.lane.b32.xlu1 %v3473_v49, %s3232_s30  ;;  %v1500_v49 = vsel %vm581_vm0, %v3809_v29, 0.0 }
 0x7b5   : > { %v3817_v7 = vpop.eup %3012 }
 0x7b6   : > { %v1503_v12 = vsel %vm581_vm0, %v3817_v7, 0.0 }
 0x7c8   : > { %1507 = vadd.xlane.f32.xlu0 %v1506_v38 }
 0x7cc   : > { %1501 = vadd.xlane.f32.xlu0 %v1500_v49 }
 0x7d4   : > { %1510 = vadd.xlane.f32.xlu1 %v1509_v2 }
 0x7d8   : > { %1504 = vadd.xlane.f32.xlu1 %v1503_v12 }
 0x7e2   : > { %1727 = vrot.lane.b32.xlu0 %v3485_v62, %s3232_s30 }
 0x7e6   : > { %1656 = vrot.lane.b32.xlu0 %v3471_v47, %s3232_s30 }
 0x7e9   : > { %1654 = vrot.lane.b32.xlu1 %v3461_v40, %s3232_s30 }
 0x7ea   : > { %1723 = vrot.lane.b32.xlu0 %v3483_v60, %s3232_s30 }
 0x7ed   : > { %1729 = vrot.lane.b32.xlu1 %v3501_v11, %s3232_s30 }
 0x7f1   : > { %1725 = vrot.lane.b32.xlu1 %v3499_v9, %s3232_s30 }
 0x818   : > { %v1490_v27 = vpop.xlane.xlu0 %1489 }
 0x819   : > { %3014 = vrcp.f32 %v1490_v27 }
 0x81a   : > { %v1493_v45 = vpop.xlane.xlu1 %1492 }
 0x81b   : > { %3016 = vrcp.f32 %v1493_v45 }
 0x81c   : > { %v1496_v62 = vpop.xlane.xlu0 %1495 }
 0x81d   : > { %3018 = vrcp.f32 %v1496_v62 }
 0x820   : > { %v1533_v57 = vpop.permute.xlu0 %1532  ;;  %v1499_v47 = vpop.xlane.xlu1 %1498 }
 0x821   : > { %3020 = vrcp.f32 %v1499_v47  ;;  %2667 = vmatprep.subr.bf16.mxu0 %v1533_v57 }
 0x822   : > { %2668 = vmatpush3.bf16.msra.mxu0 %v1533_v57 }
 0x823   : > { %v3015_v40 = vpop.eup %3014 }
 0x824   : > { %v1535_v41 = vpop.permute.xlu1 %1534  ;;  %v1659_v39 = vpop.permute.xlu0 %1658  ;;  %v1520_v11 = vmul.f32 %v3015_v40, %v3777_v55 }
 0x825   : > { %v3017_v60 = vpop.eup %3016  ;;  %2669 = vmatprep.subr.bf16.mxu0 %v1535_v41 }
 0x826   : > { %2670 = vmatpush3.bf16.msra.mxu0 %v1535_v41  ;;  %v1521_v9 = vmul.f32 %v3017_v60, %v3781_v30  ;;  %v1669_v30 = vsel %vm581_vm0, %v1659_v39, 0 }
 0x827   : > { %2751 = vmatprep.subr.msk.bf16.mxu0 %vm581_vm0, %v1659_v39  ;;  %v3019_v10 = vpop.eup %3018 }
 0x828   : > { %v1594_v3 = vpop.permute.xlu1 %1593  ;;  %v1528_v58 = vpack.c.bf16 %v1521_v9, %v1520_v11  ;;  %v1522_v14 = vmul.f32 %v3019_v10, %v3785_v0 }
 0x829   : > { %2675 = vmatprep.subr.bf16.mxu1 %v1594_v3 }
 0x82a   : > { %2671 = vmatprep.mubr.msk.bf16.mxu0 %vm581_vm0, %v1528_v58  ;;  %2676 = vmatpush3.bf16.msra.mxu1 %v1594_v3 }
 0x82b   : > { %v3021_v13 = vpop.eup %3020 }
 0x82c   : > { %v1523_v15 = vmul.f32 %v3021_v13, %v3789_v43  ;;  %v1596_v16 = vpop.permute.xlu1 %1595 }
 0x82d   : > { %2677 = vmatprep.subr.bf16.mxu1 %v1596_v16 }
 0x82e   : > { %2678 = vmatpush3.bf16.msra.mxu1 %v1596_v16  ;;  %v1529_v55 = vpack.c.bf16 %v1523_v15, %v1522_v14 }
 0x830   : > { %2672 = vmatmul.mubr.msk.bf16.vlgmr.msra.gmra.mrb[28].mxu0 %vm581_vm0, %v1529_v55  ;;  %v1661_v6 = vpop.permute.xlu1 %1660 }
 0x831   : > { %2684 = vmatpush3.bf16.xpose.msra.mxu0 %v1669_v30  ;;  %v1672_v1 = vsel %vm581_vm0, %v1661_v6, 0 }
 0x832   : > { %2752 = vmatprep.subr.msk.bf16.mxu0 %vm581_vm0, %v1661_v6 }
 0x839   : > { %2686 = vmatpush3.bf16.xpose.msra.mxu0 %v1672_v1 }
 0x855   : > { %v1508_v26 = vpop.xlane.xlu0 %1507 }
 0x859   : > { %v1502_v28 = vpop.xlane.xlu0 %1501 }
 0x85d   : > { %v1728_v0 = vpop.permute.xlu0 %1727 }
 0x85e   : > { %2753 = vmatprep.subr.msk.bf16.mxu1 %vm581_vm0, %v1728_v0  ;;  %v1738_v60 = vsel %vm581_vm0, %v1728_v0, 0 }
 0x861   : > { %v1511_v43 = vpop.xlane.xlu1 %1510  ;;  %v1657_v38 = vpop.permute.xlu0 %1656 }
 0x862   : > { %3022 = vrcp.f32 %v1511_v43 }
 0x863   : > { %3024 = vrcp.f32 %v1502_v28 }
 0x864   : > { %3026 = vrcp.f32 %v1508_v26 }
 0x865   : > { %v1505_v31 = vpop.xlane.xlu1 %1504  ;;  %v1724_v39 = vpop.permute.xlu0 %1723 }
 0x866   : > { %3028 = vrcp.f32 %v1505_v31 }
 0x869   : > { %v1655_v42 = vpop.permute.xlu1 %1654 }
 0x86a   : > { %2687 = vmatprep.mubr.msk.bf16.mxu0 %vm581_vm0, %v1655_v42 }
 0x86b   : > { %2688 = vmatmul.mubr.msk.bf16.vlgmr.msra.gmra.mrb[32].mxu0 %vm581_vm0, %v1657_v38 }
 0x86c   : > { %v3023_v49 = vpop.eup %3022 }
 0x86d   : > { %v3025_v2 = vpop.eup %3024  ;;  %v1527_v45 = vmul.f32 %v3023_v49, %v3813_v61  ;;  %v1730_v11 = vpop.permute.xlu1 %1729 }
 0x86e   : > { %v3027_v12 = vpop.eup %3026  ;;  %v1524_v62 = vmul.f32 %v3025_v2, %v3809_v29  ;;  %v1741_v29 = vsel %vm581_vm0, %v1730_v11, 0 }
 0x86f   : > { %v1526_v47 = vmul.f32 %v3027_v12, %v3805_v36 }
 0x870   : > { %v3029_v27 = vpop.eup %3028 }
 0x871   : > { %v1525_v57 = vmul.f32 %v3029_v27, %v3817_v7  ;;  %v1531_v41 = vpack.c.bf16 %v1527_v45, %v1526_v47  ;;  %v1726_v61 = vpop.permute.xlu1 %1725 }
 0x873   : > { %v1530_v40 = vpack.c.bf16 %v1525_v57, %v1524_v62 }
 0x875   : > { %2679 = vmatprep.mubr.msk.bf16.mxu1 %vm581_vm0, %v1530_v40 }
 0x876   : > { %2680 = vmatmul.mubr.msk.bf16.vlgmr.msra.gmra.mrb[36].mxu1 %vm581_vm0, %v1531_v41 }
 0x877   : > { %2692 = vmatpush3.bf16.xpose.msra.mxu1 %v1738_v60  ;;  %2695 = vmatprep.mubr.msk.bf16.mxu1 %vm581_vm0, %v1724_v39 }
 0x878   : > { %2754 = vmatprep.subr.msk.bf16.mxu1 %vm581_vm0, %v1730_v11 }
 0x87f   : > { %2694 = vmatpush3.bf16.xpose.msra.mxu1 %v1741_v29 }
 0x886   : > { %2696 = vmatmul.mubr.msk.bf16.vlgmr.msra.gmra.mrb[40].mxu1 %vm581_vm0, %v1726_v61 }
 0x903   : > { %v3857_v36 = vpop.f32.mrb[28].mxu0 }
 0x904   : > { %v3859_v7 = vpop.f32.mrb[29].mxu0 }
 0x905   : > { %v3861_v9 = vpop.f32.mrb[30].mxu0 }
 0x906   : > { %v2849_v3 = vpack.i.bf16 %v3861_v9, %v3857_v36  ;;  %v3865_v58 = vpop.f32.mrb[31].mxu0 }
 0x907   : > { %v2844_v10 = vpack.i.bf16 %v3865_v58, %v3859_v7 }
 0x93e   : > { %v2689_v13 = vpop.f32.mrb[32].mxu0 }
 0x93f   : > { %v1708_v14 = vpop.f32.mrb[33].mxu0  ;;  %v1794_v6 = vsel %vm3514_vm1, %v2689_v13, -1e+30 }
 0x940   : > { %v1792_v15 = vsel %vm3518_vm2, %v1708_v14, -1e+30  ;;  %v2690_v16 = vpop.f32.mrb[34].mxu0  ;;  %v1806_v28 = vsel %vm581_vm0, %v1794_v6, -inf }
 0x941   : > { %v1711_v55 = vpop.f32.mrb[35].mxu0  ;;  %v1800_v30 = vsel %vm581_vm0, %v1792_v15, -inf  ;;  %v1795_v0 = vsel %vm3522_vm3, %v2690_v16, -1e+30 }
 0x942   : > { %v1793_v1 = vsel %vm3528_vm4, %v1711_v55, -1e+30  ;;  %1801 = vmax.xlane.f32.xlu0 %v1800_v30  ;;  %v1809_v31 = vsel %vm581_vm0, %v1795_v0, -inf }
 0x943   : > { %v1803_v26 = vsel %vm581_vm0, %v1793_v1, -inf }
 0x944   : > { %1804 = vmax.xlane.f32.xlu1 %v1803_v26 }
 0x946   : > { %1807 = vmax.xlane.f32.xlu0 %v1806_v28 }
 0x949   : > { %v3880_v43 = vpop.f32.mrb[36].mxu1 }
 0x94a   : > { %v3883_v42 = vpop.f32.mrb[37].mxu1  ;;  %1810 = vmax.xlane.f32.xlu0 %v1809_v31 }
 0x94b   : > { %v3885_v38 = vpop.f32.mrb[38].mxu1 }
 0x94c   : > { %v2879_v49 = vpack.i.bf16 %v3885_v38, %v3880_v43  ;;  %v3889_v2 = vpop.f32.mrb[39].mxu1 }
 0x94d   : > { %v2874_v12 = vpack.i.bf16 %v3889_v2, %v3883_v42 }
 0x959   : > { %v2697_v27 = vpop.f32.mrb[40].mxu1 }
 0x95a   : > { %v1777_v45 = vpop.f32.mrb[41].mxu1  ;;  %v1798_v41 = vsel %vm3514_vm1, %v2697_v27, -1e+30 }
 0x95b   : > { %v1796_v62 = vsel %vm3518_vm2, %v1777_v45, -1e+30  ;;  %v2698_v57 = vpop.f32.mrb[42].mxu1  ;;  %v1818_v20 = vsel %vm581_vm0, %v1798_v41, -inf }
 0x95c   : > { %v1780_v47 = vpop.f32.mrb[43].mxu1  ;;  %v1812_v40 = vsel %vm581_vm0, %v1796_v62, -inf  ;;  %v1799_v11 = vsel %vm3522_vm3, %v2698_v57, -1e+30 }
 0x95d   : > { %v1797_v60 = vsel %vm3528_vm4, %v1780_v47, -1e+30  ;;  %1813 = vmax.xlane.f32.xlu0 %v1812_v40  ;;  %v1821_v29 = vsel %vm581_vm0, %v1799_v11, -inf }
 0x95e   : > { %v1815_v39 = vsel %vm581_vm0, %v1797_v60, -inf }
 0x95f   : > { %1816 = vmax.xlane.f32.xlu1 %v1815_v39 }
 0x961   : > { %1819 = vmax.xlane.f32.xlu0 %v1818_v20 }
 0x963   : > { %1822 = vmax.xlane.f32.xlu1 %v1821_v29 }
 0x9cf   : > { %v1802_v61 = vpop.xlane.xlu0 %1801 }
 0x9d0   : > { %v1824_v13 = vsub.f32 %v1792_v15, %v1802_v61 }
 0x9d1   : > { %v1805_v19 = vpop.xlane.xlu1 %1804 }
 0x9d2   : > { %v1832_v14 = vmul.f32 1.442695, %v1824_v13  ;;  %v1825_v16 = vsub.f32 %v1793_v1, %v1805_v19 }
 0x9d3   : > { %v1808_v25 = vpop.xlane.xlu0 %1807 }
 0x9d4   : > { %3030 = vpow2.f32 %v1832_v14  ;;  %v1834_v55 = vmul.f32 1.442695, %v1825_v16  ;;  %v1826_v30 = vsub.f32 %v1794_v6, %v1808_v25 }
 0x9d6   : > { %3032 = vpow2.f32 %v1834_v55  ;;  %v1836_v26 = vmul.f32 1.442695, %v1826_v30 }
 0x9d7   : > { %v1811_v22 = vpop.xlane.xlu0 %1810 }
 0x9d8   : > { %3034 = vpow2.f32 %v1836_v26  ;;  %v1827_v28 = vsub.f32 %v1795_v0, %v1811_v22 }
 0x9da   : > { %v1838_v31 = vmul.f32 1.442695, %v1827_v28 }
 0x9dc   : > { %3036 = vpow2.f32 %v1838_v31 }
 0x9de   : > { %v3031_v27 = vpop.eup %3030 }
 0x9df   : > { %v1848_v45 = vsel %vm581_vm0, %v3031_v27, 0.0 }
 0x9e0   : > { %v3033_v57 = vpop.eup %3032  ;;  %1849 = vadd.xlane.f32.xlu0 %v1848_v45 }
 0x9e1   : > { %v1851_v15 = vsel %vm581_vm0, %v3033_v57, 0.0 }
 0x9e2   : > { %v3907_v47 = vpop.eup %3034  ;;  %1852 = vadd.xlane.f32.xlu1 %v1851_v15 }
 0x9e3   : > { %v1854_v6 = vsel %vm581_vm0, %v3907_v47, 0.0 }
 0x9e4   : > { %1855 = vadd.xlane.f32.xlu0 %v1854_v6 }
 0x9e6   : > { %v3911_v1 = vpop.eup %3036 }
 0x9e7   : > { %v1857_v0 = vsel %vm581_vm0, %v3911_v1, 0.0 }
 0x9e8   : > { %1858 = vadd.xlane.f32.xlu1 %v1857_v0 }
 0x9ea   : > { %v1814_v40 = vpop.xlane.xlu0 %1813 }
 0x9eb   : > { %v1828_v39 = vsub.f32 %v1796_v62, %v1814_v40 }
 0x9ec   : > { %v1817_v62 = vpop.xlane.xlu1 %1816 }
 0x9ed   : > { %v1840_v61 = vmul.f32 1.442695, %v1828_v39  ;;  %v1829_v30 = vsub.f32 %v1797_v60, %v1817_v62 }
 0x9ee   : > { %v1820_v20 = vpop.xlane.xlu0 %1819 }
 0x9ef   : > { %v1830_v29 = vsub.f32 %v1798_v41, %v1820_v20  ;;  %v1842_v26 = vmul.f32 1.442695, %v1829_v30  ;;  %v2929_v30 = vld [vmem:[#allocation7 + $0x18] sm:$0xff]  }
 0x9f0   : > { %v1823_v25 = vpop.xlane.xlu1 %1822 }
 0x9f1   : > { %v1844_v13 = vmul.f32 1.442695, %v1830_v29  ;;  %v1831_v55 = vsub.f32 %v1799_v11, %v1823_v25  ;;  %v2927_v25 = vld [vmem:[#allocation7 + $0x8] sm:$0xff]  }
 0x9f3   : > { %3038 = vpow2.f32 %v1844_v13 }
 0x9f4   : > { %3040 = vpow2.f32 %v1840_v61 }
 0x9f9   : > { %1894 = vrot.lane.b32.xlu1 %v3479_v56, %s3232_s30  ;;  %v1846_v56 = vmul.f32 1.442695, %v1831_v55  ;;  %v2928_v55 = vld [vmem:[#allocation7 + $0x10] sm:$0xff]  }
 0x9fb   : > { %3042 = vpow2.f32 %v1846_v56  ;;  %v2932_v56 = vld [vmem:[#allocation7 + $0x30] sm:$0xff]  }
 0x9fc   : > { %3044 = vpow2.f32 %v1842_v26  ;;  %v2933_v26 = vld [vmem:[#allocation7 + $0x38] sm:$0xff]  }
 0x9fd   : > { %v3917_v19 = vpop.eup %3038  ;;  %1953 = vrot.lane.b32.xlu1 %v3497_v8, %s3232_s30 }
 0x9fe   : > { %v1866_v14 = vsel %vm581_vm0, %v3917_v19, 0.0  ;;  %v3923_v16 = vpop.eup %3040 }
 0x9ff   : > { %1867 = vadd.xlane.f32.xlu0 %v1866_v14  ;;  %v1860_v41 = vsel %vm581_vm0, %v3923_v16, 0.0 }
 0xa03   : > { %1861 = vadd.xlane.f32.xlu0 %v1860_v41  ;;  %v2926_v41 = vld [vmem:[#allocation7] sm:$0xff]  }
 0xa05   : > { %v3043_v8 = vpop.eup %3042 }
 0xa06   : > { %v1869_v22 = vsel %vm581_vm0, %v3043_v8, 0.0  ;;  %v3045_v28 = vpop.eup %3044 }
 0xa07   : > { %v1863_v60 = vsel %vm581_vm0, %v3045_v28, 0.0 }
 0xa19   : > { %1892 = vrot.lane.b32.xlu0 %v3481_v59, %s3232_s30 }
 0xa1d   : > { %2835 = vrot.lane.b32.xlu0 %v2834_v23, %s3232_s30 }
 0xa21   : > { %2845 = vrot.lane.b32.xlu0 %v2844_v10, %s3231_s23  ;;  %1870 = vadd.xlane.f32.xlu1 %v1869_v22 }
 0xa25   : > { %1864 = vadd.xlane.f32.xlu1 %v1863_v60 }
 0xa36   : > { %1955 = vrot.lane.b32.xlu1 %v3495_v5, %s3232_s30 }
 0xa3a   : > { %2840 = vrot.lane.b32.xlu1 %v2839_v18, %s3232_s30 }
 0xa3e   : > { %2850 = vrot.lane.b32.xlu1 %v2849_v3, %s3231_s23 }
 0xa6d   : > { %v1850_v59 = vpop.xlane.xlu0 %1849 }
 0xa6e   : > { %3046 = vrcp.f32 %v1850_v59 }
 0xa6f   : > { %v1853_v4 = vpop.xlane.xlu1 %1852 }
 0xa70   : > { %3048 = vrcp.f32 %v1853_v4 }
 0xa71   : > { %v1856_v63 = vpop.xlane.xlu0 %1855 }
 0xa75   : > { %v1859_v21 = vpop.xlane.xlu1 %1858 }
 0xa76   : > { %3050 = vrcp.f32 %v1859_v21 }
 0xa77   : > { %3052 = vrcp.f32 %v1856_v63 }
 0xa78   : > { %v3047_v23 = vpop.eup %3046 }
 0xa79   : > { %v1895_v7 = vpop.permute.xlu1 %1894  ;;  %v1880_v10 = vmul.f32 %v3047_v23, %v3031_v27 }
 0xa7a   : > { %v3049_v58 = vpop.eup %3048 }
 0xa7b   : > { %v1881_v5 = vmul.f32 %v3049_v58, %v3033_v57 }
 0xa7d   : > { %v1954_v11 = vpop.permute.xlu1 %1953  ;;  %v1888_v31 = vpack.c.bf16 %v1881_v5, %v1880_v10 }
 0xa7e   : > { %2707 = vmatprep.subr.bf16.mxu1 %v1954_v11 }
 0xa7f   : > { %2703 = vmatprep.mubr.msk.bf16.mxu0 %vm581_vm0, %v1888_v31  ;;  %2708 = vmatpush3.bf16.msra.mxu1 %v1954_v11 }
 0xa80   : > { %v3051_v36 = vpop.eup %3050 }
 0xa81   : > { %v3053_v3 = vpop.eup %3052  ;;  %v1883_v45 = vmul.f32 %v3051_v36, %v3911_v1 }
 0xa82   : > { %v1882_v27 = vmul.f32 %v3053_v3, %v3907_v47 }
 0xa84   : > { %v1889_v57 = vpack.c.bf16 %v1883_v45, %v1882_v27 }
 0xa8c   : > { %v1868_v17 = vpop.xlane.xlu0 %1867 }
 0xa90   : > { %v1862_v18 = vpop.xlane.xlu0 %1861 }
 0xa94   : > { %v1893_v9 = vpop.permute.xlu0 %1892 }
 0xa95   : > { %2699 = vmatprep.subr.bf16.mxu0 %v1893_v9 }
 0xa96   : > { %2700 = vmatpush3.bf16.msra.mxu0 %v1893_v9 }
 0xa97   : > { %2701 = vmatprep.subr.bf16.mxu0 %v1895_v7 }
 0xa98   : > { %v2836_v48 = vpop.permute.xlu0 %2835 }
 0xa99   : > { %v2838_v43 = vunpack.i.h.bf16 %v2836_v48  ;;  %v2837_v38 = vunpack.i.l.bf16 %v2836_v48 }
 0xa9a   : > { %2702 = vmatpush3.bf16.msra.mxu0 %v1895_v7 }
 0xa9b   : > { %2715 = vmatprep.subr.bf16.mxu0 %v2926_v41  ;;  %v2111_v11 = vsel %vm581_vm0, %v3615_v34, %v2838_v43  ;;  %v2110_v31 = vsel %vm581_vm0, %v3611_v32, %v2837_v38 }
 0xa9d   : > { %2704 = vmatmul.mubr.msk.bf16.vlgmr.msra.gmra.mrb[36].mxu0 %vm581_vm0, %v1889_v57 }
 0xa9e   : > { %2716 = vmatpush3.bf16.msra.mxu0 %v2926_v41 }
 0xa9f   : > { %2717 = vmatprep.subr.bf16.mxu0 %v2927_v25 }
 0xaa2   : > { %2718 = vmatpush3.bf16.msra.mxu0 %v2927_v25 }
 0xaa3   : > { %2719 = vmatprep.subr.bf16.mxu0 %v2928_v55 }
 0xaa6   : > { %2720 = vmatpush3.bf16.msra.mxu0 %v2928_v55 }
 0xaa7   : > { %2721 = vmatprep.subr.bf16.mxu0 %v2929_v30 }
 0xaaa   : > { %2722 = vmatpush3.bf16.msra.mxu0 %v2929_v30 }
 0xaae   : > { %v1871_v15 = vpop.xlane.xlu1 %1870 }
 0xaaf   : > { %3054 = vrcp.f32 %v1871_v15 }
 0xab0   : > { %3056 = vrcp.f32 %v1862_v18 }
 0xab1   : > { %3058 = vrcp.f32 %v1868_v17 }
 0xab2   : > { %v1865_v6 = vpop.xlane.xlu1 %1864 }
 0xab3   : > { %3060 = vrcp.f32 %v1865_v6 }
 0xab6   : > { %v1956_v0 = vpop.permute.xlu1 %1955 }
 0xab7   : > { %2709 = vmatprep.subr.bf16.mxu1 %v1956_v0 }
 0xab8   : > { %2710 = vmatpush3.bf16.msra.mxu1 %v1956_v0 }
 0xab9   : > { %v3055_v40 = vpop.eup %3054 }
 0xaba   : > { %v3057_v39 = vpop.eup %3056  ;;  %v1887_v29 = vmul.f32 %v3055_v40, %v3043_v8  ;;  %v2841_v46 = vpop.permute.xlu1 %2840 }
 0xabb   : > { %v3059_v20 = vpop.eup %3058  ;;  %v1884_v47 = vmul.f32 %v3057_v39, %v3923_v16  ;;  %v2930_v16 = vld [vmem:[#allocation7 + $0x20] sm:$0xff]   ;;  %v2843_v58 = vunpack.i.h.bf16 %v2841_v46  ;;  %v2842_v10 = vunpack.i.l.bf16 %v2841_v46 }
 0xabc   : > { %v1886_v13 = vmul.f32 %v3059_v20, %v3917_v19  ;;  %2723 = vmatprep.subr.bf16.mxu0 %v2930_v16  ;;  %v2931_v19 = vld [vmem:[#allocation7 + $0x28] sm:$0xff]   ;;  %v2459_v46 = vld [vmem:[%s4067_s3] ss:$0 sm:$0xff] }
 0xabd   : > { %v3061_v1 = vpop.eup %3060  ;;  %2724 = vmatpush3.bf16.msra.mxu0 %v2930_v16  ;;  %v2113_v17 = vsel %vm581_vm0, %v3613_v33, %v2843_v58  ;;  %v2112_v18 = vsel %vm581_vm0, %v3609_v24, %v2842_v10 }
 0xabe   : > { %v1885_v61 = vmul.f32 %v3061_v1, %v3045_v28  ;;  %v1891_v62 = vpack.c.bf16 %v1887_v29, %v1886_v13  ;;  %2725 = vmatprep.subr.bf16.mxu0 %v2931_v19 }
 0xac0   : > { %v1890_v14 = vpack.c.bf16 %v1885_v61, %v1884_v47 }
 0xac1   : > { %2726 = vmatpush3.bf16.msra.mxu0 %v2931_v19 }
 0xac2   : > { %2711 = vmatprep.mubr.msk.bf16.mxu1 %vm581_vm0, %v1890_v14  ;;  %2727 = vmatprep.subr.bf16.mxu0 %v2932_v56 }
 0xac3   : > { %2712 = vmatmul.mubr.msk.bf16.vlgmr.msra.gmra.mrb[44].mxu1 %vm581_vm0, %v1891_v62 }
 0xac5   : > { %2728 = vmatpush3.bf16.msra.mxu0 %v2932_v56 }
 0xac6   : > { %2729 = vmatprep.subr.bf16.mxu0 %v2933_v26 }
 0xac9   : > { %2730 = vmatpush3.bf16.msra.mxu0 %v2933_v26 }
 0xb70   : > { %v2705_v8 = vpop.f32.mrb[36].mxu0 }
 0xb71   : > { %v1938_v22 = vpop.f32.mrb[37].mxu0 }
 0xb72   : > { %v2706_v28 = vpop.f32.mrb[38].mxu0 }
 0xb73   : > { %v2859_v60 = vpack.i.bf16 %v2706_v28, %v2705_v8  ;;  %v1941_v59 = vpop.f32.mrb[39].mxu0 }
 0xb74   : > { %v2854_v4 = vpack.i.bf16 %v1941_v59, %v1938_v22 }
 0xb75   : > { %2860 = vrot.lane.b32.xlu1 %v2859_v60, %s3230_s21 }
 0xb76   : > { %2855 = vrot.lane.b32.xlu0 %v2854_v4, %s3230_s21 }
 0xb79   : > { %2870 = vrot.lane.b32.xlu1 %v2869_v37, %s3232_s30 }
 0xb7a   : > { %2865 = vrot.lane.b32.xlu0 %v2864_v51, %s3232_s30  ;;  %v2851_v51 = vpop.permute.xlu1 %2850 }
 0xb7b   : > { %v2853_v42 = vunpack.i.h.bf16 %v2851_v51  ;;  %v2852_v2 = vunpack.i.l.bf16 %v2851_v51 }
 0xb7d   : > { %2880 = vrot.lane.b32.xlu1 %v2879_v49, %s3231_s23  ;;  %v2846_v49 = vpop.permute.xlu0 %2845  ;;  %v2121_v45 = vsel %vm2118_vm5, %v2112_v18, %v2852_v2  ;;  %v2122_v27 = vsel %vm2118_vm5, %v2113_v17, %v2853_v42 }
 0xb7e   : > { %2875 = vrot.lane.b32.xlu0 %v2874_v12, %s3231_s23  ;;  %v2848_v12 = vunpack.i.h.bf16 %v2846_v49  ;;  %v2847_v5 = vunpack.i.l.bf16 %v2846_v49 }
 0xb80   : > { %v2119_v32 = vsel %vm2118_vm5, %v2110_v31, %v2847_v5  ;;  %v2120_v15 = vsel %vm2118_vm5, %v2111_v11, %v2848_v12 }
 0xb96   : > { %v2713_v21 = vpop.f32.mrb[44].mxu1 }
 0xb97   : > { %v1999_v23 = vpop.f32.mrb[45].mxu1 }
 0xb98   : > { %v2714_v7 = vpop.f32.mrb[46].mxu1 }
 0xb99   : > { %v2889_v44 = vpack.i.bf16 %v2714_v7, %v2713_v21  ;;  %v2002_v35 = vpop.f32.mrb[47].mxu1 }
 0xb9a   : > { %v2884_v37 = vpack.i.bf16 %v2002_v35, %v1999_v23 }
 0xb9b   : > { %2890 = vrot.lane.b32.xlu1 %v2889_v44, %s3230_s21 }
 0xb9c   : > { %2885 = vrot.lane.b32.xlu0 %v2884_v37, %s3230_s21 }
 0xbe7   : > { %v2861_v63 = vpop.permute.xlu1 %2860 }
 0xbe8   : > { %v2863_v36 = vunpack.i.h.bf16 %v2861_v63  ;;  %v2862_v9 = vunpack.i.l.bf16 %v2861_v63  ;;  %v2856_v3 = vpop.permute.xlu0 %2855 }
 0xbe9   : > { %v2858_v34 = vunpack.i.h.bf16 %v2856_v3  ;;  %v2857_v57 = vunpack.i.l.bf16 %v2856_v3 }
 0xbea   : > { %v2130_v6 = vsel %vm2127_vm6, %v2121_v45, %v2862_v9  ;;  %v2131_v33 = vsel %vm2127_vm6, %v2122_v27, %v2863_v36 }
 0xbeb   : > { %v2137_v0 = vpack.c.bf16 %v2131_v33, %v2130_v6  ;;  %v2128_v24 = vsel %vm2127_vm6, %v2119_v32, %v2857_v57  ;;  %v2129_v40 = vsel %vm2127_vm6, %v2120_v15, %v2858_v34  ;;  %v2871_v20 = vpop.permute.xlu1 %2870 }
 0xbec   : > { %v2136_v39 = vpack.c.bf16 %v2129_v40, %v2128_v24  ;;  %v2866_v1 = vpop.permute.xlu0 %2865  ;;  %v2873_v47 = vunpack.i.h.bf16 %v2871_v20  ;;  %v2872_v61 = vunpack.i.l.bf16 %v2871_v20 }
 0xbed   : > { %v2868_v14 = vunpack.i.h.bf16 %v2866_v1  ;;  %v2867_v62 = vunpack.i.l.bf16 %v2866_v1 }
 0xbee   : > { %2731 = vmatprep.mubr.bf16.mxu0 %v2136_v39  ;;  %v2117_v16 = vsel %vm581_vm0, %v3633_v53, %v2873_v47  ;;  %v2116_v19 = vsel %vm581_vm0, %v3628_v50, %v2872_v61 }
 0xbef   : > { %2732 = vmatmul.mubr.bf16.vlgmr.msra.gmra.mrb[40].mxu0 %v2137_v0  ;;  %v2881_v29 = vpop.permute.xlu1 %2880  ;;  %v2115_v26 = vsel %vm581_vm0, %v3635_v54, %v2868_v14  ;;  %v2114_v8 = vsel %vm581_vm0, %v3631_v52, %v2867_v62 }
 0xbf0   : > { %v2876_v13 = vpop.permute.xlu0 %2875  ;;  %v2883_v41 = vunpack.i.h.bf16 %v2881_v29  ;;  %v2882_v25 = vunpack.i.l.bf16 %v2881_v29 }
 0xbf1   : > { %v2878_v55 = vunpack.i.h.bf16 %v2876_v13  ;;  %v2877_v30 = vunpack.i.l.bf16 %v2876_v13 }
 0xbf2   : > { %v2125_v59 = vsel %vm2118_vm5, %v2116_v19, %v2882_v25  ;;  %v2126_v4 = vsel %vm2118_vm5, %v2117_v16, %v2883_v41 }
 0xbf3   : > { %v2123_v53 = vsel %vm2118_vm5, %v2114_v8, %v2877_v30  ;;  %v2124_v50 = vsel %vm2118_vm5, %v2115_v26, %v2878_v55 }
 0xc0d   : > { %v2891_v56 = vpop.permute.xlu1 %2890 }
 0xc0e   : > { %v2893_v22 = vunpack.i.h.bf16 %v2891_v56  ;;  %v2892_v28 = vunpack.i.l.bf16 %v2891_v56  ;;  %v2886_v60 = vpop.permute.xlu0 %2885 }
 0xc0f   : > { %v2888_v21 = vunpack.i.h.bf16 %v2886_v60  ;;  %v2887_v23 = vunpack.i.l.bf16 %v2886_v60 }
 0xc10   : > { %v2134_v7 = vsel %vm2127_vm6, %v2125_v59, %v2892_v28  ;;  %v2135_v54 = vsel %vm2127_vm6, %v2126_v4, %v2893_v22 }
 0xc11   : > { %v2132_v52 = vsel %vm2127_vm6, %v2123_v53, %v2887_v23  ;;  %v2133_v44 = vsel %vm2127_vm6, %v2124_v50, %v2888_v21  ;;  %v2139_v35 = vpack.c.bf16 %v2135_v54, %v2134_v7 }
 0xc12   : > { %v2138_v37 = vpack.c.bf16 %v2133_v44, %v2132_v52 }
 0xc14   : > { %2735 = vmatprep.mubr.bf16.mxu0 %v2138_v37 }
 0xc15   : > { %2736 = vmatmul.mubr.bf16.gmra.mrb[44].mxu0 %v2139_v35 }
 0xcc2   : > { %v2733_v48 = vpop.f32.mrb[40].mxu0 }
 0xcc3   : > { %v2254_v51 = vadd.f32 %v2733_v48, %v2459_v46  ;;  %v2245_v43 = vpop.f32.mrb[41].mxu0 }
 0xcc4   : > { %v2246_v38 = vadd.f32 %v2459_v46, %v2245_v43  ;;  %v2734_v49 = vpop.f32.mrb[42].mxu0 }
 0xcc5   : > { %2278 = vst [vmem:[%s244_s7 + $0x10] sm:$0xff] %v2254_v51  ;;  %v2257_v58 = vadd.f32 %v2734_v49, %v2459_v46  ;;  %v2248_v10 = vpop.f32.mrb[43].mxu0 }
 0xcc6   : > { %2276 = vst [vmem:[%s244_s7] sm:$0xff] %v2246_v38  ;;  %v2249_v42 = vadd.f32 %v2459_v46, %v2248_v10 }
 0xcc7   : > { %2279 = vst [vmem:[%s244_s7 + $0x18] sm:$0xff] %v2257_v58 }
 0xcc8   : > { %2277 = vst [vmem:[%s244_s7 + $0x8] sm:$0xff] %v2249_v42 }
 0xce8   : > { %v2737_v2 = vpop.f32.mrb[44].mxu0 }
 0xce9   : > { %v2270_v12 = vadd.f32 %v2737_v2, %v2459_v46  ;;  %v2261_v5 = vpop.f32.mrb[45].mxu0 }
 0xcea   : > { %v2262_v11 = vadd.f32 %v2459_v46, %v2261_v5  ;;  %v2738_v31 = vpop.f32.mrb[46].mxu0 }
 0xceb   : > { %2282 = vst [vmem:[%s244_s7 + $0x30] sm:$0xff] %v2270_v12  ;;  %v2273_v63 = vadd.f32 %v2738_v31, %v2459_v46  ;;  %v2264_v17 = vpop.f32.mrb[47].mxu0 }
 0xcec   : > { %2280 = vst [vmem:[%s244_s7 + $0x20] sm:$0xff] %v2262_v11  ;;  %v2265_v18 = vadd.f32 %v2459_v46, %v2264_v17 }
 0xced   : > { %2283 = vst [vmem:[%s244_s7 + $0x38] sm:$0xff] %v2273_v63 }
 0xcee   : > { %2281 = vst [vmem:[%s244_s7 + $0x28] sm:$0xff] %v2265_v18 }
 0xcef   : > { %3161 = shalt.err (!%p3158_p2)
}
 0xcf0   : > { %s3162_s13 = scalar_lea.hbm %s4020_s29, 1024  ;;  %s3166_s30 = scalar_lea.hbm %s4068_s4, 2048 }
 0xcf1   : > { %p3163_p13 = scmp.ne.s32.totalorder %s4020_s29, %s3162_s13  ;;  %p3167_p4 = scmp.lt.u32.totalorder %s4020_s29, %s4068_s4 }
 0xcf2   : > { %p3168_p7 = scmp.lt.u32.totalorder %s3166_s30, %s3162_s13  ;;  %p3170_p11 = scmp.lt.u32.totalorder %s3162_s13, %s4020_s29 }
 0xcf3   : > { %p3164_p6 = pnand %p3163_p13, %p4090_p0 }
 0xcf4   : > { %p3169_p8 = por %p3168_p7, %p3167_p4 }
 0xcf5   : > { %p3165_p10 = pneg %p3164_p6 }
 0xcf6   : > { %p3171_p1 = por %p3170_p11, %p3169_p8 }
 0xcf8   : > { %p3172_p3 = pnand %p3171_p1, %p3165_p10 }
 0xcfa   : > { %3175 = shalt.err (!%p3172_p3)
}
 0xcfb   : > { %s3234_s7 = smov 128   ;;  %s3235_s26 = smov 8  }
 0xcfc   : > { %2765 = dma.vmem_to_hbm [thread:$0]  (%p4090_p0), %s4015_s24, 1024, %s4020_s29, %s2285_s19, %s3234_s7, %s3234_s7, %s3235_s26  }
 0xcfd PF: > { %s2313_s28 = sand.u32 1, %s3206_s15   ;;  %p4091_p5 = scmp.ne.s32.totalorder %s4073_s22, 0 }
 0xcfe   : > { %p4092_p9 = scmp.ge.s32.totalorder %s3218_s18, 2  ;;  %s2314_s27 = scalar_lea.sflag [#allocation4], %s2313_s28 }
 0xd00   : > { %p2779_p12 = pnand %p4092_p9, %p4091_p5 }
 0xd02   : > { %3201 = dma.done.wait (!%p2779_p12), %s2314_s27, 1024  }
 0xd03   : > { %3203 = vsyncadd (!%p2779_p12), %s2314_s27, 4294966272  ;;  %p18_p2 = scmp.ge.s32.totalorder %s3371_s11, 4   ;;  %s4093_s15 = smov %s3210_s16 }
 0xd04   : > { %s4094_s16 = smov %s3214_s17  ;;  %s4095_s17 = smov %s3380_s14 }
 0xd05   : > { %s4096_s18 = smov %s3371_s11  ;;  %20 = sbr.rel (!%p18_p2) target bundleno = 6 (0x6), region = 89 }
 0xd0c   :  { %2319 = vsyncpa [#allocation3], 1 }
 0xd0d   :  { %2321 = vsyncpa [#allocation3 + $0x1], 1 }
 0xd0e   :  { %2322 = vsyncpa [#allocation6], 1 }
 0xd0f   :  { %2323 = vsyncpa [#allocation4], 1 }
 0xd10   :  { %2325 = vsyncpa [#allocation4 + $0x1], 1 }

</bundles_post_ra>
